<compile_context>
chip_gen: v6e
topology: v6e:2x2x1
jax: 0.10.0
libtpu: 0.0.40
codegen_flags: <defaults>
</compile_context>

<pallas_src>
import numpy as np
import jax
import jax.numpy as jnp
from jax import lax
from jax.experimental import pallas as pl
from jax.experimental.pallas import tpu as pltpu

EPS = 1e-5  # SwitchNorm2d eps


# ----------------------------- Pallas kernels ------------------------------

def _matmul_bias_glu_kernel(p_ref, w_ref, b_ref, o_ref):
    # p: (1, Kpad, TM)  patch tile (pixels on lanes, patch index on sublanes)
    # w: (8, Kpad)      GLU weights: out channels rows 0..3, gate rows 4..7
    # b: (8, 1)         GLU bias, same row layout
    # o: (1, 4, TM)     lane-dense GLU output (only the first Cout/2 rows of
    #                   the original conv are meaningful; padded rows are 0)
    y = jnp.dot(w_ref[...], p_ref[0], preferred_element_type=jnp.float32)
    y = y + b_ref[...]
    o_ref[0] = y[:4, :] * jax.nn.sigmoid(y[4:, :])


def _pick_tm(m, target=1024):
    """Largest pixel tile <= target that divides m and keeps lanes dense."""
    if m <= target or m % 128:
        return m
    tm = (target // 128) * 128
    while tm > 128 and m % tm:
        tm -= 128
    return tm if (tm > 0 and m % tm == 0) else m


def matmul_bias_glu(p, wg, bg):
    """p: (B, Kpad, M) f32; wg: (8, Kpad); bg: (8, 1) -> (B, 4, M) f32."""
    b, kpad, m = p.shape
    tm = _pick_tm(m)
    return pl.pallas_call(
        _matmul_bias_glu_kernel,
        out_shape=jax.ShapeDtypeStruct((b, 4, m), jnp.float32),
        grid=(b, m // tm),
        in_specs=[
            pl.BlockSpec((1, kpad, tm), lambda bi, mi: (bi, 0, mi)),
            pl.BlockSpec((8, kpad), lambda bi, mi: (0, 0)),     # resident
            pl.BlockSpec((8, 1), lambda bi, mi: (0, 0)),        # resident
        ],
        out_specs=pl.BlockSpec((1, 4, tm), lambda bi, mi: (bi, 0, mi)),
        compiler_params=pltpu.CompilerParams(
            dimension_semantics=("parallel", "parallel")),
    )(p, wg, bg)


def _switchnorm_residual_kernel(res_ref, y_ref, g_ref, be_ref, mw_ref, vw_ref, o_ref):
    # res/y/o: (B, C, HW); g/be: (1, C, 1); mw/vw: (3,) softmaxed weights (SMEM).
    y = y_ref[...]
    hw = y.shape[-1]
    mean_in = jnp.mean(y, axis=-1, keepdims=True)                            # (B,C,1)
    var_in = jnp.sum((y - mean_in) ** 2, axis=-1, keepdims=True) / (hw - 1)  # unbiased (torch .var)
    mean_ln = jnp.mean(mean_in, axis=1, keepdims=True)                       # (B,1,1)
    temp = var_in + mean_in * mean_in
    var_ln = jnp.mean(temp, axis=1, keepdims=True) - mean_ln * mean_ln
    mean_bn = jnp.mean(mean_in, axis=0, keepdims=True)                       # (1,C,1)
    var_bn = jnp.mean(temp, axis=0, keepdims=True) - mean_bn * mean_bn
    mean = mw_ref[0] * mean_in + mw_ref[1] * mean_ln + mw_ref[2] * mean_bn
    var = vw_ref[0] * var_in + vw_ref[1] * var_ln + vw_ref[2] * var_bn
    xhat = (y - mean) * lax.rsqrt(var + EPS)
    o_ref[...] = res_ref[...] + xhat * g_ref[...] + be_ref[...]


def switchnorm_residual(res, y, gamma, beta, mw, vw):
    # TODO(synk): BN stats span the whole (B, HW) extent; for large H*W this
    #   single-block kernel should become a two-pass, HW-tiled pipeline.
    b, c, hw = y.shape
    vspec = pl.BlockSpec((b, c, hw), lambda i: (0, 0, 0))
    pspec = pl.BlockSpec((1, c, 1), lambda i: (0, 0, 0))
    sspec = pl.BlockSpec(memory_space=pltpu.MemorySpace.SMEM)
    return pl.pallas_call(
        _switchnorm_residual_kernel,
        out_shape=jax.ShapeDtypeStruct((b, c, hw), jnp.float32),
        grid=(1,),
        in_specs=[vspec, vspec, pspec, pspec, sspec, sspec],
        out_specs=vspec,
    )(res, y, gamma, beta, mw, vw)


# ------------------------------- JAX glue -----------------------------------

def _round_up(v, m):
    return (v + m - 1) // m * m


def im2col_t(x, kh, kw, dil, ph, pw, out_h, out_w):
    """x: (B,C,H,W) -> patches (B, round_up(C*kh*kw, 8), out_h*out_w).

    K (= C*kh*kw, flattened as cin*kh*kw + i*kw + j) lands on sublanes, the
    pixel index (h*out_w + w) lands on lanes.  Only pads K to a multiple of 8.
    """
    b, c, _, _ = x.shape
    xp = jnp.pad(x, ((0, 0), (0, 0), (ph, ph), (pw, pw)))
    cols = []
    for i in range(kh):
        for j in range(kw):
            cols.append(xp[:, :, i * dil:i * dil + out_h, j * dil:j * dil + out_w])
    pat = jnp.stack(cols, axis=2)                                   # (B,C,KH*KW,oh,ow)
    k = c * kh * kw
    p = pat.reshape(b, k, out_h * out_w)
    return jnp.pad(p, ((0, 0), (0, _round_up(k, 8) - k), (0, 0)))


def prep_glu_conv(w, bias):
    """torch Conv2d weight (Cout,Cin,KH,KW) + bias -> (8,Kpad) GLU matmul operands."""
    cout, cin, kh, kw = w.shape
    half = cout // 2
    k = cin * kh * kw
    kpad = _round_up(k, 8)
    wm = w.reshape(cout, k).astype(jnp.float32)
    wg = jnp.zeros((8, kpad), jnp.float32)
    wg = wg.at[:half, :k].set(wm[:half])                # out channels -> rows 0..3
    wg = wg.at[4:4 + half, :k].set(wm[half:])           # gate channels -> rows 4..7
    bg = jnp.zeros((8, 1), jnp.float32)
    bg = bg.at[:half, 0].set(bias[:half])
    bg = bg.at[4:4 + half, 0].set(bias[half:])
    return wg, bg


def conv2d_glu(x, wg, bg, half, kh, kw, dil, ph, pw):
    b_, _, h_, w_ = x.shape
    p = im2col_t(x, kh, kw, dil, ph, pw, h_, w_)        # (B, Kpad, H*W)
    y = matmul_bias_glu(p, wg, bg)                      # (B, 4, H*W) lane-dense
    return y[:, :half].reshape(b_, half, h_, w_)        # NCHW (reshape = free)


def conv_transpose_glu(x, wg, bg, half):
    # ConvTranspose2d(4,8,[3,32],stride=[1,2],padding=[1,15]) + GLU via
    # zero insertion (stride) + conv with flipped/swapped kernel, pad (1,16).
    b_, c_, h_, w_ = x.shape
    xz = jnp.zeros((b_, c_, h_, 2 * w_ - 1), x.dtype).at[:, :, :, ::2].set(x)
    p = im2col_t(xz, 3, 32, 1, 1, 16, h_, 2 * w_)
    y = matmul_bias_glu(p, wg, bg)
    return y[:, :half].reshape(b_, half, h_, 2 * w_)


def upcond_forward(pp, x):
    b, h, w = x.shape
    v = x[:, None, :, :]                                            # (B,1,H,W)
    v = conv2d_glu(v, pp['c1'][0], pp['c1'][1], 4, 1, 1, 1, 0, 0)   # (B,4,H,W)
    v = conv_transpose_glu(v, pp['up'][0], pp['up'][1], 4)          # (B,4,H,2W)
    w2 = 2 * w
    for blk, d in zip(pp['blocks'], (1, 2, 4)):                     # covD dilations 2**(i%3)
        for ck, nk, ks in (('C1', 'n1', 3), ('C2', 'n2', 5)):
            pad = (ks + (ks - 1) * (d - 1)) // 2
            g = conv2d_glu(v, blk[ck][0], blk[ck][1], 4, ks, ks, d, pad, pad)
            sn = blk[nk]
            v = switchnorm_residual(
                v.reshape(b, 4, h * w2), g.reshape(b, 4, h * w2),
                sn['gamma'], sn['beta'], sn['mw'], sn['vw']).reshape(b, 4, h, w2)
    v = conv2d_glu(v, pp['c3'][0], pp['c3'][1], 1, 1, 1, 1, 0, 0)   # (B,1,H,2W)
    return v[:, 0]                                                  # (B,H,2W)


# ---------------------- parameter init (deterministic) ----------------------

def init_params(key):
    keys = jax.random.split(key, 48)
    it = iter(keys)

    def conv_init(cout, cin, kh, kw, transposed=False):
        s = 1.0 / np.sqrt(cin * kh * kw)
        shape = (cin, cout, kh, kw) if transposed else (cout, cin, kh, kw)
        w = jax.random.uniform(next(it), shape, jnp.float32, -s, s)
        b = jax.random.uniform(next(it), (cout,), jnp.float32, -s, s)
        return w, b

    def sn_init():
        return {
            'gamma': 1.0 + 0.1 * jax.random.normal(next(it), (4,), jnp.float32),
            'beta': 0.1 * jax.random.normal(next(it), (4,), jnp.float32),
            'mw_raw': 1.0 + 0.5 * jax.random.normal(next(it), (3,), jnp.float32),
            'vw_raw': 1.0 + 0.5 * jax.random.normal(next(it), (3,), jnp.float32),
        }

    raw = {}
    raw['c1_w'], raw['c1_b'] = conv_init(8, 1, 1, 1)
    raw['up_w'], raw['up_b'] = conv_init(8, 4, 3, 32, transposed=True)   # (in,out,kh,kw)
    raw['c3_w'], raw['c3_b'] = conv_init(2, 4, 1, 1)
    raw['blocks'] = []
    for _ in range(3):
        blk = {}
        blk['C1_w'], blk['C1_b'] = conv_init(8, 4, 3, 3)
        blk['C2_w'], blk['C2_b'] = conv_init(8, 4, 5, 5)
        blk['n1'] = sn_init()
        blk['n2'] = sn_init()
        raw['blocks'].append(blk)
    return raw


def prep_params(raw):
    pp = {'c1': prep_glu_conv(raw['c1_w'], raw['c1_b']),
          'c3': prep_glu_conv(raw['c3_w'], raw['c3_b'])}
    # transposed-conv -> equivalent regular conv weight (swap io, flip spatial)
    w_conv = jnp.transpose(raw['up_w'], (1, 0, 2, 3))[:, :, ::-1, ::-1]
    pp['up'] = prep_glu_conv(w_conv, raw['up_b'])
    pp['blocks'] = []
    for blk in raw['blocks']:
        pblk = {'C1': prep_glu_conv(blk['C1_w'], blk['C1_b']),
                'C2': prep_glu_conv(blk['C2_w'], blk['C2_b'])}
        for nk in ('n1', 'n2'):
            sn = blk[nk]
            pblk[nk] = {'gamma': sn['gamma'].reshape(1, 4, 1),
                        'beta': sn['beta'].reshape(1, 4, 1),
                        'mw': jax.nn.softmax(sn['mw_raw']),
                        'vw': jax.nn.softmax(sn['vw_raw'])}
        pp['blocks'].append(pblk)
    return pp


# ------------------------- pure-JAX reference check --------------------------

def ref_forward(raw, x):
    dn = ('NCHW', 'OIHW', 'NCHW')

    def conv(v, w, bias, dil=1, pad=(0, 0), lhs_dil=(1, 1)):
        y = lax.conv_general_dilated(
            v, w, window_strides=(1, 1),
            padding=[(pad[0], pad[0]), (pad[1], pad[1])],
            lhs_dilation=lhs_dil, rhs_dilation=(dil, dil),
            dimension_numbers=dn, precision=lax.Precision.HIGHEST)
        return y + bias[None, :, None, None]

    def glu(v):
        half = v.shape[1] // 2
        return v[:, :half] * jax.nn.sigmoid(v[:, half:])

    def sn(v, p):
        n, c, hh, ww = v.shape
        xr = v.reshape(n, c, hh * ww)
        mean_in = xr.mean(-1, keepdims=True)
        var_in = xr.var(-1, keepdims=True, ddof=1)
        mean_ln = mean_in.mean(1, keepdims=True)
        temp = var_in + mean_in ** 2
        var_ln = temp.mean(1, keepdims=True) - mean_ln ** 2
        mean_bn = mean_in.mean(0, keepdims=True)
        var_bn = temp.mean(0, keepdims=True) - mean_bn ** 2
        mw = jax.nn.softmax(p['mw_raw'])
        vw = jax.nn.softmax(p['vw_raw'])
        mean = mw[0] * mean_in + mw[1] * mean_ln + mw[2] * mean_bn
        var = vw[0] * var_in + vw[1] * var_ln + vw[2] * var_bn
        xh = ((xr - mean) / jnp.sqrt(var + EPS)).reshape(n, c, hh, ww)
        return xh * p['gamma'][None, :, None, None] + p['beta'][None, :, None, None]

    v = x[:, None]
    v = glu(conv(v, raw['c1_w'], raw['c1_b']))
    w_conv = jnp.transpose(raw['up_w'], (1, 0, 2, 3))[:, :, ::-1, ::-1]
    v = glu(conv(v, w_conv, raw['up_b'], pad=(1, 16), lhs_dil=(1, 2)))
    for blk, d in zip(raw['blocks'], (1, 2, 4)):
        for ck, nk, ks in (('C1', 'n1', 3), ('C2', 'n2', 5)):
            pad = (ks + (ks - 1) * (d - 1)) // 2
            g = glu(conv(v, blk[ck + '_w'], blk[ck + '_b'], dil=d, pad=(pad, pad)))
            v = v + sn(g, blk[nk])
    v = glu(conv(v, raw['c3_w'], raw['c3_b']))
    return v[:, 0]


# ----------------------------------- main ------------------------------------

if __name__ == "__main__":
    key = jax.random.PRNGKey(0)
    pkey, xkey = jax.random.split(key)
    raw = init_params(pkey)
    pp = prep_params(raw)

    B, H, W = 2, 16, 16
    x = jax.random.normal(xkey, (B, H, W), jnp.float32)

    out = jax.jit(upcond_forward)(pp, x)
    out = jax.block_until_ready(out)
    assert out.shape == (B, H, 2 * W), out.shape

    ref = jax.block_until_ready(jax.jit(ref_forward)(raw, x))
    if not np.allclose(np.asarray(out), np.asarray(ref), atol=2e-2, rtol=2e-2):
        err = float(jnp.max(jnp.abs(out - ref)))
        raise AssertionError(f"Pallas output mismatch vs pure-JAX reference (max abs err {err})")

    print("KERNEL_OK")
</pallas_src>

<mosaic_0001>
module attributes {stable_mosaic.version = 11 : i64} {
  func.func @_matmul_bias_glu_kernel(%arg0: i32, %arg1: i32, %arg2: memref<1x8x256xf32, #tpu.memory_space<vmem>>, %arg3: memref<8x8xf32, #tpu.memory_space<vmem>>, %arg4: memref<8x1xf32, #tpu.memory_space<vmem>>, %arg5: memref<1x4x256xf32, #tpu.memory_space<vmem>>) attributes {dimension_semantics = [#tpu.dimension_semantics<parallel>, #tpu.dimension_semantics<parallel>], iteration_bounds = array<i64: 2, 1>, scalar_prefetch = 0 : i64, scratch_operands = 0 : i64, tpu.core_type = #tpu.core_type<tc>, window_params = [{transform_indices = @transform_0, window_bounds = array<i64: 1, 8, 256>}, {pipeline_mode = #tpu.pipeline_mode<synchronous>, transform_indices = @transform_1, window_bounds = array<i64: 8, 8>}, {pipeline_mode = #tpu.pipeline_mode<synchronous>, transform_indices = @transform_2, window_bounds = array<i64: 8, 1>}, {transform_indices = @transform_3, window_bounds = array<i64: 1, 4, 256>}]} {
    %c0 = arith.constant 0 : index
    %c0_0 = arith.constant 0 : index
    %0 = vector.load %arg3[%c0, %c0_0] : memref<8x8xf32, #tpu.memory_space<vmem>>, vector<8x8xf32>
    %c0_1 = arith.constant 0 : index
    %c0_2 = arith.constant 0 : index
    %c0_3 = arith.constant 0 : index
    %1 = vector.load %arg2[%c0_1, %c0_2, %c0_3] : memref<1x8x256xf32, #tpu.memory_space<vmem>>, vector<1x8x256xf32>
    %2 = vector.shape_cast %1 : vector<1x8x256xf32> to vector<8x256xf32>
    %cst = arith.constant dense<0.000000e+00> : vector<8x256xf32>
    %3 = tpu.matmul %0, %2, %cst {dimension_numbers = #tpu.dot_dimension_numbers<[1], [0], [0], [1], [0, 0, 1, 1], [], []>} : vector<8x8xf32>, vector<8x256xf32>, vector<8x256xf32> -> vector<8x256xf32>
    %c0_4 = arith.constant 0 : index
    %c0_5 = arith.constant 0 : index
    %4 = vector.load %arg4[%c0_4, %c0_5] : memref<8x1xf32, #tpu.memory_space<vmem>>, vector<8x1xf32>
    %5 = vector.broadcast %4 : vector<8x1xf32> to vector<8x256xf32>
    %6 = arith.addf %3, %5 : vector<8x256xf32>
    %7 = vector.extract_strided_slice %6 {offsets = [0, 0], sizes = [4, 256], strides = [1, 1]} : vector<8x256xf32> to vector<4x256xf32>
    %8 = vector.extract_strided_slice %6 {offsets = [4, 0], sizes = [4, 256], strides = [1, 1]} : vector<8x256xf32> to vector<4x256xf32>
    %9 = arith.negf %8 : vector<4x256xf32>
    %10 = math.exp %9 : vector<4x256xf32>
    %cst_6 = arith.constant 1.000000e+00 : f32
    %11 = vector.broadcast %cst_6 : f32 to vector<4x256xf32>
    %12 = arith.addf %11, %10 : vector<4x256xf32>
    %13 = arith.divf %11, %12 : vector<4x256xf32>
    %14 = arith.mulf %7, %13 : vector<4x256xf32>
    %c0_7 = arith.constant 0 : index
    %c0_8 = arith.constant 0 : index
    %c0_9 = arith.constant 0 : index
    %15 = vector.load %arg5[%c0_7, %c0_8, %c0_9] : memref<1x4x256xf32, #tpu.memory_space<vmem>>, vector<1x4x256xf32>
    %16 = vector.shape_cast %15 : vector<1x4x256xf32> to vector<4x256xf32>
    %17 = vector.shape_cast %14 : vector<4x256xf32> to vector<1x4x256xf32>
    tpu.vector_store %arg5[%c0_7, %c0_8, %c0_9], %17 {strides = array<i32>} : memref<1x4x256xf32, #tpu.memory_space<vmem>>, vector<1x4x256xf32>,
    return
  }
  func.func @transform_0(%arg0: i32, %arg1: i32) -> (i32, i32, i32) {
    %c0_i32 = arith.constant 0 : i32
    %c0_i32_0 = arith.constant 0 : i32
    return %arg0, %c0_i32, %arg1 : i32, i32, i32
  }
  func.func @transform_1(%arg0: i32, %arg1: i32) -> (i32, i32) {
    %c0_i32 = arith.constant 0 : i32
    %c0_i32_0 = arith.constant 0 : i32
    %c0_i32_1 = arith.constant 0 : i32
    return %c0_i32, %c0_i32_0 : i32, i32
  }
  func.func @transform_2(%arg0: i32, %arg1: i32) -> (i32, i32) {
    %c0_i32 = arith.constant 0 : i32
    %c0_i32_0 = arith.constant 0 : i32
    %c0_i32_1 = arith.constant 0 : i32
    return %c0_i32, %c0_i32_0 : i32, i32
  }
  func.func @transform_3(%arg0: i32, %arg1: i32) -> (i32, i32, i32) {
    %c0_i32 = arith.constant 0 : i32
    %c0_i32_0 = arith.constant 0 : i32
    return %arg0, %c0_i32, %arg1 : i32, i32, i32
  }
}

module attributes {stable_mosaic.version = 11 : i64} {
  func.func @_matmul_bias_glu_kernel(%arg0: i32, %arg1: i32, %arg2: memref<1x384x512xf32, #tpu.memory_space<vmem>>, %arg3: memref<8x384xf32, #tpu.memory_space<vmem>>, %arg4: memref<8x1xf32, #tpu.memory_space<vmem>>, %arg5: memref<1x4x512xf32, #tpu.memory_space<vmem>>) attributes {dimension_semantics = [#tpu.dimension_semantics<parallel>, #tpu.dimension_semantics<parallel>], iteration_bounds = array<i64: 2, 1>, scalar_prefetch = 0 : i64, scratch_operands = 0 : i64, tpu.core_type = #tpu.core_type<tc>, window_params = [{transform_indices = @transform_0, window_bounds = array<i64: 1, 384, 512>}, {pipeline_mode = #tpu.pipeline_mode<synchronous>, transform_indices = @transform_1, window_bounds = array<i64: 8, 384>}, {pipeline_mode = #tpu.pipeline_mode<synchronous>, transform_indices = @transform_2, window_bounds = array<i64: 8, 1>}, {transform_indices = @transform_3, window_bounds = array<i64: 1, 4, 512>}]} {
    %c0 = arith.constant 0 : index
    %c0_0 = arith.constant 0 : index
    %0 = vector.load %arg3[%c0, %c0_0] : memref<8x384xf32, #tpu.memory_space<vmem>>, vector<8x384xf32>
    %c0_1 = arith.constant 0 : index
    %c0_2 = arith.constant 0 : index
    %c0_3 = arith.constant 0 : index
    %1 = vector.load %arg2[%c0_1, %c0_2, %c0_3] : memref<1x384x512xf32, #tpu.memory_space<vmem>>, vector<1x384x512xf32>
    %2 = vector.shape_cast %1 : vector<1x384x512xf32> to vector<384x512xf32>
    %cst = arith.constant dense<0.000000e+00> : vector<8x512xf32>
    %3 = tpu.matmul %0, %2, %cst {dimension_numbers = #tpu.dot_dimension_numbers<[1], [0], [0], [1], [0, 0, 1, 1], [], []>} : vector<8x384xf32>, vector<384x512xf32>, vector<8x512xf32> -> vector<8x512xf32>
    %c0_4 = arith.constant 0 : index
    %c0_5 = arith.constant 0 : index
    %4 = vector.load %arg4[%c0_4, %c0_5] : memref<8x1xf32, #tpu.memory_space<vmem>>, vector<8x1xf32>
    %5 = vector.broadcast %4 : vector<8x1xf32> to vector<8x512xf32>
    %6 = arith.addf %3, %5 : vector<8x512xf32>
    %7 = vector.extract_strided_slice %6 {offsets = [0, 0], sizes = [4, 512], strides = [1, 1]} : vector<8x512xf32> to vector<4x512xf32>
    %8 = vector.extract_strided_slice %6 {offsets = [4, 0], sizes = [4, 512], strides = [1, 1]} : vector<8x512xf32> to vector<4x512xf32>
    %9 = arith.negf %8 : vector<4x512xf32>
    %10 = math.exp %9 : vector<4x512xf32>
    %cst_6 = arith.constant 1.000000e+00 : f32
    %11 = vector.broadcast %cst_6 : f32 to vector<4x512xf32>
    %12 = arith.addf %11, %10 : vector<4x512xf32>
    %13 = arith.divf %11, %12 : vector<4x512xf32>
    %14 = arith.mulf %7, %13 : vector<4x512xf32>
    %c0_7 = arith.constant 0 : index
    %c0_8 = arith.constant 0 : index
    %c0_9 = arith.constant 0 : index
    %15 = vector.load %arg5[%c0_7, %c0_8, %c0_9] : memref<1x4x512xf32, #tpu.memory_space<vmem>>, vector<1x4x512xf32>
    %16 = vector.shape_cast %15 : vector<1x4x512xf32> to vector<4x512xf32>
    %17 = vector.shape_cast %14 : vector<4x512xf32> to vector<1x4x512xf32>
    tpu.vector_store %arg5[%c0_7, %c0_8, %c0_9], %17 {strides = array<i32>} : memref<1x4x512xf32, #tpu.memory_space<vmem>>, vector<1x4x512xf32>,
    return
  }
  func.func @transform_0(%arg0: i32, %arg1: i32) -> (i32, i32, i32) {
    %c0_i32 = arith.constant 0 : i32
    %c0_i32_0 = arith.constant 0 : i32
    return %arg0, %c0_i32, %arg1 : i32, i32, i32
  }
  func.func @transform_1(%arg0: i32, %arg1: i32) -> (i32, i32) {
    %c0_i32 = arith.constant 0 : i32
    %c0_i32_0 = arith.constant 0 : i32
    %c0_i32_1 = arith.constant 0 : i32
    return %c0_i32, %c0_i32_0 : i32, i32
  }
  func.func @transform_2(%arg0: i32, %arg1: i32) -> (i32, i32) {
    %c0_i32 = arith.constant 0 : i32
    %c0_i32_0 = arith.constant 0 : i32
    %c0_i32_1 = arith.constant 0 : i32
    return %c0_i32, %c0_i32_0 : i32, i32
  }
  func.func @transform_3(%arg0: i32, %arg1: i32) -> (i32, i32, i32) {
    %c0_i32 = arith.constant 0 : i32
    %c0_i32_0 = arith.constant 0 : i32
    return %arg0, %c0_i32, %arg1 : i32, i32, i32
  }
}

module attributes {stable_mosaic.version = 11 : i64} {
  func.func @_matmul_bias_glu_kernel(%arg0: i32, %arg1: i32, %arg2: memref<1x40x512xf32, #tpu.memory_space<vmem>>, %arg3: memref<8x40xf32, #tpu.memory_space<vmem>>, %arg4: memref<8x1xf32, #tpu.memory_space<vmem>>, %arg5: memref<1x4x512xf32, #tpu.memory_space<vmem>>) attributes {dimension_semantics = [#tpu.dimension_semantics<parallel>, #tpu.dimension_semantics<parallel>], iteration_bounds = array<i64: 2, 1>, scalar_prefetch = 0 : i64, scratch_operands = 0 : i64, tpu.core_type = #tpu.core_type<tc>, window_params = [{transform_indices = @transform_0, window_bounds = array<i64: 1, 40, 512>}, {pipeline_mode = #tpu.pipeline_mode<synchronous>, transform_indices = @transform_1, window_bounds = array<i64: 8, 40>}, {pipeline_mode = #tpu.pipeline_mode<synchronous>, transform_indices = @transform_2, window_bounds = array<i64: 8, 1>}, {transform_indices = @transform_3, window_bounds = array<i64: 1, 4, 512>}]} {
    %c0 = arith.constant 0 : index
    %c0_0 = arith.constant 0 : index
    %0 = vector.load %arg3[%c0, %c0_0] : memref<8x40xf32, #tpu.memory_space<vmem>>, vector<8x40xf32>
    %c0_1 = arith.constant 0 : index
    %c0_2 = arith.constant 0 : index
    %c0_3 = arith.constant 0 : index
    %1 = vector.load %arg2[%c0_1, %c0_2, %c0_3] : memref<1x40x512xf32, #tpu.memory_space<vmem>>, vector<1x40x512xf32>
    %2 = vector.shape_cast %1 : vector<1x40x512xf32> to vector<40x512xf32>
    %cst = arith.constant dense<0.000000e+00> : vector<8x512xf32>
    %3 = tpu.matmul %0, %2, %cst {dimension_numbers = #tpu.dot_dimension_numbers<[1], [0], [0], [1], [0, 0, 1, 1], [], []>} : vector<8x40xf32>, vector<40x512xf32>, vector<8x512xf32> -> vector<8x512xf32>
    %c0_4 = arith.constant 0 : index
    %c0_5 = arith.constant 0 : index
    %4 = vector.load %arg4[%c0_4, %c0_5] : memref<8x1xf32, #tpu.memory_space<vmem>>, vector<8x1xf32>
    %5 = vector.broadcast %4 : vector<8x1xf32> to vector<8x512xf32>
    %6 = arith.addf %3, %5 : vector<8x512xf32>
    %7 = vector.extract_strided_slice %6 {offsets = [0, 0], sizes = [4, 512], strides = [1, 1]} : vector<8x512xf32> to vector<4x512xf32>
    %8 = vector.extract_strided_slice %6 {offsets = [4, 0], sizes = [4, 512], strides = [1, 1]} : vector<8x512xf32> to vector<4x512xf32>
    %9 = arith.negf %8 : vector<4x512xf32>
    %10 = math.exp %9 : vector<4x512xf32>
    %cst_6 = arith.constant 1.000000e+00 : f32
    %11 = vector.broadcast %cst_6 : f32 to vector<4x512xf32>
    %12 = arith.addf %11, %10 : vector<4x512xf32>
    %13 = arith.divf %11, %12 : vector<4x512xf32>
    %14 = arith.mulf %7, %13 : vector<4x512xf32>
    %c0_7 = arith.constant 0 : index
    %c0_8 = arith.constant 0 : index
    %c0_9 = arith.constant 0 : index
    %15 = vector.load %arg5[%c0_7, %c0_8, %c0_9] : memref<1x4x512xf32, #tpu.memory_space<vmem>>, vector<1x4x512xf32>
    %16 = vector.shape_cast %15 : vector<1x4x512xf32> to vector<4x512xf32>
    %17 = vector.shape_cast %14 : vector<4x512xf32> to vector<1x4x512xf32>
    tpu.vector_store %arg5[%c0_7, %c0_8, %c0_9], %17 {strides = array<i32>} : memref<1x4x512xf32, #tpu.memory_space<vmem>>, vector<1x4x512xf32>,
    return
  }
  func.func @transform_0(%arg0: i32, %arg1: i32) -> (i32, i32, i32) {
    %c0_i32 = arith.constant 0 : i32
    %c0_i32_0 = arith.constant 0 : i32
    return %arg0, %c0_i32, %arg1 : i32, i32, i32
  }
  func.func @transform_1(%arg0: i32, %arg1: i32) -> (i32, i32) {
    %c0_i32 = arith.constant 0 : i32
    %c0_i32_0 = arith.constant 0 : i32
    %c0_i32_1 = arith.constant 0 : i32
    return %c0_i32, %c0_i32_0 : i32, i32
  }
  func.func @transform_2(%arg0: i32, %arg1: i32) -> (i32, i32) {
    %c0_i32 = arith.constant 0 : i32
    %c0_i32_0 = arith.constant 0 : i32
    %c0_i32_1 = arith.constant 0 : i32
    return %c0_i32, %c0_i32_0 : i32, i32
  }
  func.func @transform_3(%arg0: i32, %arg1: i32) -> (i32, i32, i32) {
    %c0_i32 = arith.constant 0 : i32
    %c0_i32_0 = arith.constant 0 : i32
    return %arg0, %c0_i32, %arg1 : i32, i32, i32
  }
}

module attributes {stable_mosaic.version = 11 : i64} {
  func.func @_switchnorm_residual_kernel(%arg0: i32, %arg1: memref<2x4x512xf32, #tpu.memory_space<vmem>>, %arg2: memref<2x4x512xf32, #tpu.memory_space<vmem>>, %arg3: memref<1x4x1xf32, #tpu.memory_space<vmem>>, %arg4: memref<1x4x1xf32, #tpu.memory_space<vmem>>, %arg5: memref<3xf32, #tpu.memory_space<smem>>, %arg6: memref<3xf32, #tpu.memory_space<smem>>, %arg7: memref<2x4x512xf32, #tpu.memory_space<vmem>>) attributes {dimension_semantics = [#tpu.dimension_semantics<arbitrary>], iteration_bounds = array<i64: 1>, scalar_prefetch = 0 : i64, scratch_operands = 0 : i64, tpu.core_type = #tpu.core_type<tc>, window_params = [{pipeline_mode = #tpu.pipeline_mode<synchronous>, transform_indices = @transform_0, window_bounds = array<i64: 2, 4, 512>}, {pipeline_mode = #tpu.pipeline_mode<synchronous>, transform_indices = @transform_1, window_bounds = array<i64: 2, 4, 512>}, {pipeline_mode = #tpu.pipeline_mode<synchronous>, transform_indices = @transform_2, window_bounds = array<i64: 1, 4, 1>}, {pipeline_mode = #tpu.pipeline_mode<synchronous>, transform_indices = @transform_3, window_bounds = array<i64: 1, 4, 1>}, {transform_indices = @transform_4, window_bounds = array<i64: 3>}, {transform_indices = @transform_5, window_bounds = array<i64: 3>}, {pipeline_mode = #tpu.pipeline_mode<synchronous>, transform_indices = @transform_6, window_bounds = array<i64: 2, 4, 512>}]} {
    %c0 = arith.constant 0 : index
    %c0_0 = arith.constant 0 : index
    %c0_1 = arith.constant 0 : index
    %0 = vector.load %arg2[%c0, %c0_0, %c0_1] : memref<2x4x512xf32, #tpu.memory_space<vmem>>, vector<2x4x512xf32>
    %cst = arith.constant dense<0.000000e+00> : vector<2x4xf32>
    %1 = vector.multi_reduction <add>, %0, %cst [2] : vector<2x4x512xf32> to vector<2x4xf32>
    %2 = vector.shape_cast %1 : vector<2x4xf32> to vector<2x4x1xf32>
    %cst_2 = arith.constant 5.120000e+02 : f32
    %3 = vector.broadcast %cst_2 : f32 to vector<2x4x1xf32>
    %4 = arith.divf %2, %3 : vector<2x4x1xf32>
    %5 = vector.broadcast %4 : vector<2x4x1xf32> to vector<2x4x512xf32>
    %6 = arith.subf %0, %5 : vector<2x4x512xf32>
    %7 = arith.mulf %6, %6 : vector<2x4x512xf32>
    %cst_3 = arith.constant dense<0.000000e+00> : vector<2x4xf32>
    %8 = vector.multi_reduction <add>, %7, %cst_3 [2] : vector<2x4x512xf32> to vector<2x4xf32>
    %9 = vector.shape_cast %8 : vector<2x4xf32> to vector<2x4x1xf32>
    %cst_4 = arith.constant 5.110000e+02 : f32
    %10 = vector.broadcast %cst_4 : f32 to vector<2x4x1xf32>
    %11 = arith.divf %9, %10 : vector<2x4x1xf32>
    %cst_5 = arith.constant dense<0.000000e+00> : vector<2x1xf32>
    %12 = vector.multi_reduction <add>, %4, %cst_5 [1] : vector<2x4x1xf32> to vector<2x1xf32>
    %13 = vector.shape_cast %12 : vector<2x1xf32> to vector<2x1x1xf32>
    %cst_6 = arith.constant 4.000000e+00 : f32
    %14 = vector.broadcast %cst_6 : f32 to vector<2x1x1xf32>
    %15 = arith.divf %13, %14 : vector<2x1x1xf32>
    %16 = arith.mulf %4, %4 : vector<2x4x1xf32>
    %17 = arith.addf %11, %16 : vector<2x4x1xf32>
    %cst_7 = arith.constant dense<0.000000e+00> : vector<2x1xf32>
    %18 = vector.multi_reduction <add>, %17, %cst_7 [1] : vector<2x4x1xf32> to vector<2x1xf32>
    %19 = vector.shape_cast %18 : vector<2x1xf32> to vector<2x1x1xf32>
    %cst_8 = arith.constant 4.000000e+00 : f32
    %20 = vector.broadcast %cst_8 : f32 to vector<2x1x1xf32>
    %21 = arith.divf %19, %20 : vector<2x1x1xf32>
    %22 = arith.mulf %15, %15 : vector<2x1x1xf32>
    %23 = arith.subf %21, %22 : vector<2x1x1xf32>
    %cst_9 = arith.constant dense<0.000000e+00> : vector<4x1xf32>
    %24 = vector.multi_reduction <add>, %4, %cst_9 [0] : vector<2x4x1xf32> to vector<4x1xf32>
    %25 = vector.shape_cast %24 : vector<4x1xf32> to vector<1x4x1xf32>
    %cst_10 = arith.constant 2.000000e+00 : f32
    %26 = vector.broadcast %cst_10 : f32 to vector<1x4x1xf32>
    %27 = arith.divf %25, %26 : vector<1x4x1xf32>
    %cst_11 = arith.constant dense<0.000000e+00> : vector<4x1xf32>
    %28 = vector.multi_reduction <add>, %17, %cst_11 [0] : vector<2x4x1xf32> to vector<4x1xf32>
    %29 = vector.shape_cast %28 : vector<4x1xf32> to vector<1x4x1xf32>
    %cst_12 = arith.constant 2.000000e+00 : f32
    %30 = vector.broadcast %cst_12 : f32 to vector<1x4x1xf32>
    %31 = arith.divf %29, %30 : vector<1x4x1xf32>
    %32 = arith.mulf %27, %27 : vector<1x4x1xf32>
    %33 = arith.subf %31, %32 : vector<1x4x1xf32>
    %c0_13 = arith.constant 0 : index
    %34 = memref.load %arg5[%c0_13] : memref<3xf32, #tpu.memory_space<smem>>
    %35 = vector.broadcast %34 : f32 to vector<2x4x1xf32>
    %36 = arith.mulf %35, %4 : vector<2x4x1xf32>
    %c1 = arith.constant 1 : index
    %37 = memref.load %arg5[%c1] : memref<3xf32, #tpu.memory_space<smem>>
    %38 = vector.broadcast %37 : f32 to vector<2x1x1xf32>
    %39 = arith.mulf %38, %15 : vector<2x1x1xf32>
    %40 = vector.broadcast %39 : vector<2x1x1xf32> to vector<2x4x1xf32>
    %41 = arith.addf %36, %40 : vector<2x4x1xf32>
    %c2 = arith.constant 2 : index
    %42 = memref.load %arg5[%c2] : memref<3xf32, #tpu.memory_space<smem>>
    %43 = vector.broadcast %42 : f32 to vector<1x4x1xf32>
    %44 = arith.mulf %43, %27 : vector<1x4x1xf32>
    %45 = vector.broadcast %44 : vector<1x4x1xf32> to vector<2x4x1xf32>
    %46 = arith.addf %41, %45 : vector<2x4x1xf32>
    %c0_14 = arith.constant 0 : index
    %47 = memref.load %arg6[%c0_14] : memref<3xf32, #tpu.memory_space<smem>>
    %48 = vector.broadcast %47 : f32 to vector<2x4x1xf32>
    %49 = arith.mulf %48, %11 : vector<2x4x1xf32>
    %c1_15 = arith.constant 1 : index
    %50 = memref.load %arg6[%c1_15] : memref<3xf32, #tpu.memory_space<smem>>
    %51 = vector.broadcast %50 : f32 to vector<2x1x1xf32>
    %52 = arith.mulf %51, %23 : vector<2x1x1xf32>
    %53 = vector.broadcast %52 : vector<2x1x1xf32> to vector<2x4x1xf32>
    %54 = arith.addf %49, %53 : vector<2x4x1xf32>
    %c2_16 = arith.constant 2 : index
    %55 = memref.load %arg6[%c2_16] : memref<3xf32, #tpu.memory_space<smem>>
    %56 = vector.broadcast %55 : f32 to vector<1x4x1xf32>
    %57 = arith.mulf %56, %33 : vector<1x4x1xf32>
    %58 = vector.broadcast %57 : vector<1x4x1xf32> to vector<2x4x1xf32>
    %59 = arith.addf %54, %58 : vector<2x4x1xf32>
    %60 = vector.broadcast %46 : vector<2x4x1xf32> to vector<2x4x512xf32>
    %61 = arith.subf %0, %60 : vector<2x4x512xf32>
    %cst_17 = arith.constant 9.99999974E-6 : f32
    %62 = vector.broadcast %cst_17 : f32 to vector<2x4x1xf32>
    %63 = arith.addf %59, %62 : vector<2x4x1xf32>
    %64 = math.rsqrt %63 : vector<2x4x1xf32>
    %65 = vector.broadcast %64 : vector<2x4x1xf32> to vector<2x4x512xf32>
    %66 = arith.mulf %61, %65 : vector<2x4x512xf32>
    %c0_18 = arith.constant 0 : index
    %c0_19 = arith.constant 0 : index
    %c0_20 = arith.constant 0 : index
    %67 = vector.load %arg1[%c0_18, %c0_19, %c0_20] : memref<2x4x512xf32, #tpu.memory_space<vmem>>, vector<2x4x512xf32>
    %c0_21 = arith.constant 0 : index
    %c0_22 = arith.constant 0 : index
    %c0_23 = arith.constant 0 : index
    %68 = vector.load %arg3[%c0_21, %c0_22, %c0_23] : memref<1x4x1xf32, #tpu.memory_space<vmem>>, vector<1x4x1xf32>
    %69 = vector.broadcast %68 : vector<1x4x1xf32> to vector<2x4x512xf32>
    %70 = arith.mulf %66, %69 : vector<2x4x512xf32>
    %71 = arith.addf %67, %70 : vector<2x4x512xf32>
    %c0_24 = arith.constant 0 : index
    %c0_25 = arith.constant 0 : index
    %c0_26 = arith.constant 0 : index
    %72 = vector.load %arg4[%c0_24, %c0_25, %c0_26] : memref<1x4x1xf32, #tpu.memory_space<vmem>>, vector<1x4x1xf32>
    %73 = vector.broadcast %72 : vector<1x4x1xf32> to vector<2x4x512xf32>
    %74 = arith.addf %71, %73 : vector<2x4x512xf32>
    %c0_27 = arith.constant 0 : index
    %c0_28 = arith.constant 0 : index
    %c0_29 = arith.constant 0 : index
    %75 = vector.load %arg7[%c0_27, %c0_28, %c0_29] : memref<2x4x512xf32, #tpu.memory_space<vmem>>, vector<2x4x512xf32>
    tpu.vector_store %arg7[%c0_27, %c0_28, %c0_29], %74 {strides = array<i32>} : memref<2x4x512xf32, #tpu.memory_space<vmem>>, vector<2x4x512xf32>,
    return
  }
  func.func @transform_0(%arg0: i32) -> (i32, i32, i32) {
    %c0_i32 = arith.constant 0 : i32
    %c0_i32_0 = arith.constant 0 : i32
    %c0_i32_1 = arith.constant 0 : i32
    %c0_i32_2 = arith.constant 0 : i32
    return %c0_i32, %c0_i32_0, %c0_i32_1 : i32, i32, i32
  }
  func.func @transform_1(%arg0: i32) -> (i32, i32, i32) {
    %c0_i32 = arith.constant 0 : i32
    %c0_i32_0 = arith.constant 0 : i32
    %c0_i32_1 = arith.constant 0 : i32
    %c0_i32_2 = arith.constant 0 : i32
    return %c0_i32, %c0_i32_0, %c0_i32_1 : i32, i32, i32
  }
  func.func @transform_2(%arg0: i32) -> (i32, i32, i32) {
    %c0_i32 = arith.constant 0 : i32
    %c0_i32_0 = arith.constant 0 : i32
    %c0_i32_1 = arith.constant 0 : i32
    %c0_i32_2 = arith.constant 0 : i32
    return %c0_i32, %c0_i32_0, %c0_i32_1 : i32, i32, i32
  }
  func.func @transform_3(%arg0: i32) -> (i32, i32, i32) {
    %c0_i32 = arith.constant 0 : i32
    %c0_i32_0 = arith.constant 0 : i32
    %c0_i32_1 = arith.constant 0 : i32
    %c0_i32_2 = arith.constant 0 : i32
    return %c0_i32, %c0_i32_0, %c0_i32_1 : i32, i32, i32
  }
  func.func @transform_4(%arg0: i32) -> i32 {
    %c0_i32 = arith.constant 0 : i32
    %c0_i32_0 = arith.constant 0 : i32
    return %c0_i32 : i32
  }
  func.func @transform_5(%arg0: i32) -> i32 {
    %c0_i32 = arith.constant 0 : i32
    %c0_i32_0 = arith.constant 0 : i32
    return %c0_i32 : i32
  }
  func.func @transform_6(%arg0: i32) -> (i32, i32, i32) {
    %c0_i32 = arith.constant 0 : i32
    %c0_i32_0 = arith.constant 0 : i32
    %c0_i32_1 = arith.constant 0 : i32
    %c0_i32_2 = arith.constant 0 : i32
    return %c0_i32, %c0_i32_0, %c0_i32_1 : i32, i32, i32
  }
}

module attributes {stable_mosaic.version = 11 : i64} {
  func.func @_matmul_bias_glu_kernel(%arg0: i32, %arg1: i32, %arg2: memref<1x104x512xf32, #tpu.memory_space<vmem>>, %arg3: memref<8x104xf32, #tpu.memory_space<vmem>>, %arg4: memref<8x1xf32, #tpu.memory_space<vmem>>, %arg5: memref<1x4x512xf32, #tpu.memory_space<vmem>>) attributes {dimension_semantics = [#tpu.dimension_semantics<parallel>, #tpu.dimension_semantics<parallel>], iteration_bounds = array<i64: 2, 1>, scalar_prefetch = 0 : i64, scratch_operands = 0 : i64, tpu.core_type = #tpu.core_type<tc>, window_params = [{transform_indices = @transform_0, window_bounds = array<i64: 1, 104, 512>}, {pipeline_mode = #tpu.pipeline_mode<synchronous>, transform_indices = @transform_1, window_bounds = array<i64: 8, 104>}, {pipeline_mode = #tpu.pipeline_mode<synchronous>, transform_indices = @transform_2, window_bounds = array<i64: 8, 1>}, {transform_indices = @transform_3, window_bounds = array<i64: 1, 4, 512>}]} {
    %c0 = arith.constant 0 : index
    %c0_0 = arith.constant 0 : index
    %0 = vector.load %arg3[%c0, %c0_0] : memref<8x104xf32, #tpu.memory_space<vmem>>, vector<8x104xf32>
    %c0_1 = arith.constant 0 : index
    %c0_2 = arith.constant 0 : index
    %c0_3 = arith.constant 0 : index
    %1 = vector.load %arg2[%c0_1, %c0_2, %c0_3] : memref<1x104x512xf32, #tpu.memory_space<vmem>>, vector<1x104x512xf32>
    %2 = vector.shape_cast %1 : vector<1x104x512xf32> to vector<104x512xf32>
    %cst = arith.constant dense<0.000000e+00> : vector<8x512xf32>
    %3 = tpu.matmul %0, %2, %cst {dimension_numbers = #tpu.dot_dimension_numbers<[1], [0], [0], [1], [0, 0, 1, 1], [], []>} : vector<8x104xf32>, vector<104x512xf32>, vector<8x512xf32> -> vector<8x512xf32>
    %c0_4 = arith.constant 0 : index
    %c0_5 = arith.constant 0 : index
    %4 = vector.load %arg4[%c0_4, %c0_5] : memref<8x1xf32, #tpu.memory_space<vmem>>, vector<8x1xf32>
    %5 = vector.broadcast %4 : vector<8x1xf32> to vector<8x512xf32>
    %6 = arith.addf %3, %5 : vector<8x512xf32>
    %7 = vector.extract_strided_slice %6 {offsets = [0, 0], sizes = [4, 512], strides = [1, 1]} : vector<8x512xf32> to vector<4x512xf32>
    %8 = vector.extract_strided_slice %6 {offsets = [4, 0], sizes = [4, 512], strides = [1, 1]} : vector<8x512xf32> to vector<4x512xf32>
    %9 = arith.negf %8 : vector<4x512xf32>
    %10 = math.exp %9 : vector<4x512xf32>
    %cst_6 = arith.constant 1.000000e+00 : f32
    %11 = vector.broadcast %cst_6 : f32 to vector<4x512xf32>
    %12 = arith.addf %11, %10 : vector<4x512xf32>
    %13 = arith.divf %11, %12 : vector<4x512xf32>
    %14 = arith.mulf %7, %13 : vector<4x512xf32>
    %c0_7 = arith.constant 0 : index
    %c0_8 = arith.constant 0 : index
    %c0_9 = arith.constant 0 : index
    %15 = vector.load %arg5[%c0_7, %c0_8, %c0_9] : memref<1x4x512xf32, #tpu.memory_space<vmem>>, vector<1x4x512xf32>
    %16 = vector.shape_cast %15 : vector<1x4x512xf32> to vector<4x512xf32>
    %17 = vector.shape_cast %14 : vector<4x512xf32> to vector<1x4x512xf32>
    tpu.vector_store %arg5[%c0_7, %c0_8, %c0_9], %17 {strides = array<i32>} : memref<1x4x512xf32, #tpu.memory_space<vmem>>, vector<1x4x512xf32>,
    return
  }
  func.func @transform_0(%arg0: i32, %arg1: i32) -> (i32, i32, i32) {
    %c0_i32 = arith.constant 0 : i32
    %c0_i32_0 = arith.constant 0 : i32
    return %arg0, %c0_i32, %arg1 : i32, i32, i32
  }
  func.func @transform_1(%arg0: i32, %arg1: i32) -> (i32, i32) {
    %c0_i32 = arith.constant 0 : i32
    %c0_i32_0 = arith.constant 0 : i32
    %c0_i32_1 = arith.constant 0 : i32
    return %c0_i32, %c0_i32_0 : i32, i32
  }
  func.func @transform_2(%arg0: i32, %arg1: i32) -> (i32, i32) {
    %c0_i32 = arith.constant 0 : i32
    %c0_i32_0 = arith.constant 0 : i32
    %c0_i32_1 = arith.constant 0 : i32
    return %c0_i32, %c0_i32_0 : i32, i32
  }
  func.func @transform_3(%arg0: i32, %arg1: i32) -> (i32, i32, i32) {
    %c0_i32 = arith.constant 0 : i32
    %c0_i32_0 = arith.constant 0 : i32
    return %arg0, %c0_i32, %arg1 : i32, i32, i32
  }
}

module attributes {stable_mosaic.version = 11 : i64} {
  func.func @_matmul_bias_glu_kernel(%arg0: i32, %arg1: i32, %arg2: memref<1x8x512xf32, #tpu.memory_space<vmem>>, %arg3: memref<8x8xf32, #tpu.memory_space<vmem>>, %arg4: memref<8x1xf32, #tpu.memory_space<vmem>>, %arg5: memref<1x4x512xf32, #tpu.memory_space<vmem>>) attributes {dimension_semantics = [#tpu.dimension_semantics<parallel>, #tpu.dimension_semantics<parallel>], iteration_bounds = array<i64: 2, 1>, scalar_prefetch = 0 : i64, scratch_operands = 0 : i64, tpu.core_type = #tpu.core_type<tc>, window_params = [{transform_indices = @transform_0, window_bounds = array<i64: 1, 8, 512>}, {pipeline_mode = #tpu.pipeline_mode<synchronous>, transform_indices = @transform_1, window_bounds = array<i64: 8, 8>}, {pipeline_mode = #tpu.pipeline_mode<synchronous>, transform_indices = @transform_2, window_bounds = array<i64: 8, 1>}, {transform_indices = @transform_3, window_bounds = array<i64: 1, 4, 512>}]} {
    %c0 = arith.constant 0 : index
    %c0_0 = arith.constant 0 : index
    %0 = vector.load %arg3[%c0, %c0_0] : memref<8x8xf32, #tpu.memory_space<vmem>>, vector<8x8xf32>
    %c0_1 = arith.constant 0 : index
    %c0_2 = arith.constant 0 : index
    %c0_3 = arith.constant 0 : index
    %1 = vector.load %arg2[%c0_1, %c0_2, %c0_3] : memref<1x8x512xf32, #tpu.memory_space<vmem>>, vector<1x8x512xf32>
    %2 = vector.shape_cast %1 : vector<1x8x512xf32> to vector<8x512xf32>
    %cst = arith.constant dense<0.000000e+00> : vector<8x512xf32>
    %3 = tpu.matmul %0, %2, %cst {dimension_numbers = #tpu.dot_dimension_numbers<[1], [0], [0], [1], [0, 0, 1, 1], [], []>} : vector<8x8xf32>, vector<8x512xf32>, vector<8x512xf32> -> vector<8x512xf32>
    %c0_4 = arith.constant 0 : index
    %c0_5 = arith.constant 0 : index
    %4 = vector.load %arg4[%c0_4, %c0_5] : memref<8x1xf32, #tpu.memory_space<vmem>>, vector<8x1xf32>
    %5 = vector.broadcast %4 : vector<8x1xf32> to vector<8x512xf32>
    %6 = arith.addf %3, %5 : vector<8x512xf32>
    %7 = vector.extract_strided_slice %6 {offsets = [0, 0], sizes = [4, 512], strides = [1, 1]} : vector<8x512xf32> to vector<4x512xf32>
    %8 = vector.extract_strided_slice %6 {offsets = [4, 0], sizes = [4, 512], strides = [1, 1]} : vector<8x512xf32> to vector<4x512xf32>
    %9 = arith.negf %8 : vector<4x512xf32>
    %10 = math.exp %9 : vector<4x512xf32>
    %cst_6 = arith.constant 1.000000e+00 : f32
    %11 = vector.broadcast %cst_6 : f32 to vector<4x512xf32>
    %12 = arith.addf %11, %10 : vector<4x512xf32>
    %13 = arith.divf %11, %12 : vector<4x512xf32>
    %14 = arith.mulf %7, %13 : vector<4x512xf32>
    %c0_7 = arith.constant 0 : index
    %c0_8 = arith.constant 0 : index
    %c0_9 = arith.constant 0 : index
    %15 = vector.load %arg5[%c0_7, %c0_8, %c0_9] : memref<1x4x512xf32, #tpu.memory_space<vmem>>, vector<1x4x512xf32>
    %16 = vector.shape_cast %15 : vector<1x4x512xf32> to vector<4x512xf32>
    %17 = vector.shape_cast %14 : vector<4x512xf32> to vector<1x4x512xf32>
    tpu.vector_store %arg5[%c0_7, %c0_8, %c0_9], %17 {strides = array<i32>} : memref<1x4x512xf32, #tpu.memory_space<vmem>>, vector<1x4x512xf32>,
    return
  }
  func.func @transform_0(%arg0: i32, %arg1: i32) -> (i32, i32, i32) {
    %c0_i32 = arith.constant 0 : i32
    %c0_i32_0 = arith.constant 0 : i32
    return %arg0, %c0_i32, %arg1 : i32, i32, i32
  }
  func.func @transform_1(%arg0: i32, %arg1: i32) -> (i32, i32) {
    %c0_i32 = arith.constant 0 : i32
    %c0_i32_0 = arith.constant 0 : i32
    %c0_i32_1 = arith.constant 0 : i32
    return %c0_i32, %c0_i32_0 : i32, i32
  }
  func.func @transform_2(%arg0: i32, %arg1: i32) -> (i32, i32) {
    %c0_i32 = arith.constant 0 : i32
    %c0_i32_0 = arith.constant 0 : i32
    %c0_i32_1 = arith.constant 0 : i32
    return %c0_i32, %c0_i32_0 : i32, i32
  }
  func.func @transform_3(%arg0: i32, %arg1: i32) -> (i32, i32, i32) {
    %c0_i32 = arith.constant 0 : i32
    %c0_i32_0 = arith.constant 0 : i32
    return %arg0, %c0_i32, %arg1 : i32, i32, i32
  }
}

</mosaic_0001>

<bundles_post_ra>
// kernel: upcond_forward.15
= control target key start
LH: loop header
LB: loop body
LE: loop exit
PB: predicated region body
PF: predicated region fallthrough
CT: control target
= control target key end

     0   :  { %8 = vsyncpa [#allocation3], 0  ;;  %s572_s12 = smov 0   ;;  %s574_s13 = smov 0   ;;  %s638_s0 = inlined_call_operand.vmem [shape: f32[2,8,256], index: 0, kind: input, shape index: {}]   ;;  %s639_s1 = inlined_call_operand.hbm [shape: f32[8,8], index: 1, kind: input, shape index: {}]   ;;  %s640_s2 = inlined_call_operand.vmem [shape: f32[8,1], index: 2, kind: input, shape index: {}]   ;;  %s641_s3 = inlined_call_operand.vmem [shape: f32[2,4,256], index: 3, kind: output, shape index: {}]  }
   0x1   :  { %s576_s14 = smov 0  }
   0x2 LB: > { %s431_s15 = sadd.s32 4294967295, %s547_s14   ;;  %s26_s16 = sadd.s32 1, %s543_s13  ;;  %s547_s14 = sphi %s576_s14, %s14_s14   ;;  %s543_s13 = sphi %s574_s13, %s645_s13   ;;  %s539_s12 = sphi %s572_s12, %s644_s12  }
   0x3   : > { %p28_p0 = scmp.ge.s32.totalorder %s26_s16, 2  ;;  %p433_p1 = scmp.ge.s32.totalorder %s547_s14, 1 }
   0x4   : > { %p129_p2 = scmp.lt.s32.totalorder %s547_s14, 3  ;;  %p597_p4 = scmp.eq.s32.totalorder %s431_s15, 0 }
   0x5   : > { %s647_s16 = smov (%p28_p0, %s26_s16), 0  ;;  %s549_s19 = smov [#allocation2]  }
   0x6   : > { %p593_p3 = pnand %p433_p1, %p129_p2  ;;  %s142_s20 = sshll.u32 %s549_s19, 4  ;;  %s143_s20 = int_to_ptr.vmem [resolvable:$true] %s142_s20 }
   0x7   : > { %s506_s21 = scalar_lea.vmem %s143_s20, 128  ;;  %p514_p11 = scmp.lt.s32.totalorder %s143_s20, %s143_s20 }
   0x8   : > { %p453_p5 = pneg %p593_p3  ;;  %p507_p8 = scmp.ne.s32.totalorder %s143_s20, %s506_s21 }
   0x9   : > { %p515_p12 = scmp.lt.s32.totalorder %s506_s21, %s506_s21 }
   0xa   : > { %p454_p6 = pnand %p597_p4, %p453_p5 }
   0xb   : > { %p516_p13 = por %p515_p12, %p514_p11 }
   0xc   : > { %p497_p7 = pneg %p454_p6 }
   0xe   : > { %p509_p9 = pnand %p507_p8, %p497_p7 }
  0x10   : > { %p510_p10 = pneg %p509_p9 }
  0x12   : > { %p517_p0 = pnand %p516_p13, %p510_p10 }
  0x14   : > { %520 = shalt.err (!%p517_p0)
}
  0x15   : > { %456 = dma.hbm_to_vmem [thread:$0]  (!%p454_p6), %s639_s1, 128, %s143_s20, [#allocation3]  }
  0x16   : > { %171 = sbr.rel (%p593_p3) target bundleno = 272 (0x110), region = 32 }
  0x1b   : > { %534 = dma.done.wait (%p597_p4), [#allocation3], 128  }
  0x1c   : > { %536 = vsyncadd (%p597_p4), [#allocation3], 4294967168  ;;  %p204_p1 = scmp.lt.s32.totalorder %s539_s12, 1  ;;  %v550_v0 = vmov 0.0   ;;  %v551_v1 = vmov 0   ;;  %v223_v4 = vld [vmem:[#allocation2] sm:$0xff] }
  0x1d   : > { %300 = vmatprep.mubr.f32.mxu0 %v550_v0  ;;  %486 = vset.pattern.permute.xlu0 %v551_v1  ;;  %vm232_vm0 = vcmask 64512   ;;  %v226_v5 = vld [vmem:[%s640_s2] sm:$0xff] }
  0x1e   : > { %s649_s12 = smov (!%p204_p1, %s539_s12), 1  ;;  %229 = vperm.xlu0 %486, %v226_v5  }
  0x1f   : > { %s447_s24 = sshll.u32 %s649_s12, 4  ;;  %s448_s30 = sshll.u32 %s649_s12, 3 }
  0x20   : > { %s211_s27 = scalar_lea.vmem %s638_s0, %s447_s24  ;;  %s221_s6 = scalar_lea.vmem %s641_s3, %s448_s30 }
  0x21   : > { %v225_v2 = vld [vmem:[%s211_s27 + $0x8] sm:$0xff]  ;;  %v224_v3 = vld [vmem:[%s211_s27] sm:$0xff] }
  0x22   : > { %266 = vmatprep.subr.mxu0 %v225_v2 }
  0x23   : > { %267 = vmatpush1.msra.mxu0 %v224_v3 }
  0x24   : > { %442 = vmatmul.mubr.msk.f32.vlgmr.msra.gmra.mxu0 %vm232_vm0, %v223_v4 }
  0x99   : > { %v230_v6 = vpop.permute.xlu0 %229 }
  0xe4   : > { %v302_v7 = vpop.f32.mrf.mxu0 }
  0xe5   : > { %v303_v8 = vadd.f32 %v302_v7, %v230_v6 }
  0xe6   : > { %v304_v9 = vpop.f32.mrf.mxu0 }
  0xe7   : > { %v443_v10 = vmul.f32 -1.442695, %v303_v8  ;;  %v305_v11 = vadd.f32 %v304_v9, %v230_v6 }
  0xe9   : > { %487 = vpow2.f32 %v443_v10  ;;  %v444_v12 = vmul.f32 -1.442695, %v305_v11 }
  0xeb   : > { %489 = vpow2.f32 %v444_v12 }
  0xf6   : > { %v488_v13 = vpop.eup %487 }
  0xf7   : > { %v313_v14 = vadd.f32 1.0, %v488_v13 }
  0xf8   : > { %v490_v15 = vpop.eup %489 }
  0xf9   : > { %491 = vrcp.f32 %v313_v14  ;;  %v314_v16 = vadd.f32 1.0, %v490_v15 }
  0xfb   : > { %493 = vrcp.f32 %v314_v16 }
 0x106   : > { %v492_v17 = vpop.eup %491 }
 0x107   : > { %v321_v18 = vrot.slane %v492_v17, 4 }
 0x108   : > { %v494_v19 = vpop.eup %493 }
 0x109   : > { %v322_v20 = vrot.slane %v494_v19, 4  ;;  %v325_v21 = vmul.f32 %v321_v18, %v303_v8 }
 0x10b   : > { %v326_v22 = vmul.f32 %v322_v20, %v305_v11 }
 0x10d   : > { %v329_v23 = vcombine.low %v325_v21, %v326_v22 }
 0x10f   : > { %331 = vst [vmem:[%s221_s6] sm:$0xff] %v329_v23 }
 0x110 PF: > { %s14_s14 = sadd.s32 1, %s547_s14   ;;  %s644_s12 = smov %s543_s13 }
 0x111   : > { %p11_p2 = scmp.ge.s32.totalorder %s14_s14, 4   ;;  %s645_s13 = smov %s647_s16 }
 0x113   :  { %13 = sbr.rel (!%p11_p2) target bundleno = 2 (0x2), region = 67 }
 0x118   :  { %362 = vsyncpa [#allocation3], 1 }
 0x119   :  { %364 = vsyncpa [#allocation3 + $0x1], 1 }

// kernel: upcond_forward.16
= control target key start
LH: loop header
LB: loop body
LE: loop exit
PB: predicated region body
PF: predicated region fallthrough
CT: control target
= control target key end

     0   :  { %s937_s12 = smov 0   ;;  %s939_s13 = smov 0   ;;  %s1194_s0 = inlined_call_operand.vmem [shape: f32[2,384,512], index: 0, kind: input, shape index: {}]   ;;  %s1195_s1 = inlined_call_operand.vmem [shape: f32[8,384], index: 1, kind: input, shape index: {}]   ;;  %s1196_s2 = inlined_call_operand.vmem [shape: f32[8,1], index: 2, kind: input, shape index: {}]   ;;  %s1197_s3 = inlined_call_operand.vmem [shape: f32[2,4,512], index: 3, kind: output, shape index: {}]  }
   0x1   :  { %s941_s14 = smov 0  }
   0x2 LB: > { %s25_s15 = sadd.s32 1, %s909_s13  ;;  %p836_p0 = scmp.ge.s32.totalorder %s913_s14, 1  ;;  %s913_s14 = sphi %s941_s14, %s13_s14   ;;  %s909_s13 = sphi %s939_s13, %s1199_s13   ;;  %s905_s12 = sphi %s937_s12, %s1198_s12  }
   0x3   : > { %p27_p1 = scmp.ge.s32.totalorder %s25_s15, 2  ;;  %p158_p2 = scmp.lt.s32.totalorder %s913_s14, 3 }
   0x5   : > { %s1201_s15 = smov (%p27_p1, %s25_s15), 0  ;;  %p159_p3 = pnand %p836_p0, %p158_p2 }
   0x6   : > { %p191_p4 = scmp.lt.s32.totalorder (!%p159_p3), %s905_s12, 1 }
   0x7   : > { %162 = sbr.rel (%p159_p3) target bundleno = 353 (0x161), region = 32 }
   0xc   : > { %v958_v0 = vld [vmem:[%s1195_s1 + $0x8] sm:$0xff]  ;;  %v915_v1 = vmov 0.0   ;;  %v405_v2 = vld [vmem:[%s1196_s2] sm:$0xff]  ;;  %s1203_s12 = smov (!%p191_p4, %s905_s12), 1  ;;  %v916_v3 = vmov 0  }
   0xd   : > { %546 = vmatprep.mubr.f32.mxu1 %v915_v1  ;;  %475 = vmatprep.mubr.f32.mxu0 %v958_v0  ;;  %s847_s20 = smul.u32 1536, %s1203_s12  ;;  %s846_s28 = sshll.u32 %s1203_s12, 4 }
   0xe   : > { %874 = vset.pattern.permute.xlu0 %v916_v3  ;;  %s208_s4 = scalar_lea.vmem %s1197_s3, %s846_s28 }
   0xf   : > { %408 = vperm.xlu0 %874, %v405_v2   ;;  %s971_s23 = scalar_lea.vmem %s1194_s0, %s847_s20 }
  0x10   : > { %v274_v4 = vld [vmem:[%s971_s23 + $0x1e8] sm:$0xff]  ;;  %v273_v6 = vld [vmem:[%s971_s23 + $0x1e0] sm:$0xff] }
  0x11   : > { %v402_v5 = vld [vmem:[%s971_s23 + $0x5e8] sm:$0xff]  ;;  %411 = vmatprep.subr.mxu0 %v274_v4  ;;  %v401_v7 = vld [vmem:[%s971_s23 + $0x5e0] sm:$0xff] }
  0x12   : > { %482 = vmatprep.subr.mxu1 %v402_v5  ;;  %v270_v8 = vld [vmem:[%s971_s23 + $0x1c8] sm:$0xff]  ;;  %412 = vmatpush1.msra.mxu0 %v273_v6  ;;  %v269_v10 = vld [vmem:[%s971_s23 + $0x1c0] sm:$0xff] }
  0x13   : > { %v398_v9 = vld [vmem:[%s971_s23 + $0x5c8] sm:$0xff]  ;;  %483 = vmatpush1.msra.mxu1 %v401_v7  ;;  %v397_v11 = vld [vmem:[%s971_s23 + $0x5c0] sm:$0xff]  ;;  %413 = vmatprep.subr.mxu0 %v270_v8  ;;  %v1041_v7 = vld [vmem:[%s1195_s1 + $0x10] sm:$0xff] }
  0x14   : > { %v266_v12 = vld [vmem:[%s971_s23 + $0x1a8] sm:$0xff]  ;;  %484 = vmatprep.subr.mxu1 %v398_v9  ;;  %v265_v14 = vld [vmem:[%s971_s23 + $0x1a0] sm:$0xff]  ;;  %414 = vmatpush1.msra.mxu0 %v269_v10  ;;  %v276_v8 = vld [vmem:[%s971_s23 + $0x1f8] sm:$0xff] }
  0x15   : > { %v394_v13 = vld [vmem:[%s971_s23 + $0x5a8] sm:$0xff]  ;;  %v393_v15 = vld [vmem:[%s971_s23 + $0x5a0] sm:$0xff]  ;;  %485 = vmatpush1.msra.mxu1 %v397_v11  ;;  %415 = vmatprep.subr.mxu0 %v266_v12  ;;  %v275_v10 = vld [vmem:[%s971_s23 + $0x1f0] sm:$0xff] }
  0x16   : > { %v262_v16 = vld [vmem:[%s971_s23 + $0x188] sm:$0xff]  ;;  %486 = vmatprep.subr.mxu1 %v394_v13  ;;  %v261_v18 = vld [vmem:[%s971_s23 + $0x180] sm:$0xff]  ;;  %416 = vmatpush1.msra.mxu0 %v265_v14  ;;  %v272_v12 = vld [vmem:[%s971_s23 + $0x1d8] sm:$0xff] }
  0x17   : > { %v390_v17 = vld [vmem:[%s971_s23 + $0x588] sm:$0xff]  ;;  %v389_v19 = vld [vmem:[%s971_s23 + $0x580] sm:$0xff]  ;;  %487 = vmatpush1.msra.mxu1 %v393_v15  ;;  %417 = vmatprep.subr.mxu0 %v262_v16  ;;  %v271_v14 = vld [vmem:[%s971_s23 + $0x1d0] sm:$0xff] }
  0x18   : > { %v258_v20 = vld [vmem:[%s971_s23 + $0x168] sm:$0xff]  ;;  %488 = vmatprep.subr.mxu1 %v390_v17  ;;  %v257_v22 = vld [vmem:[%s971_s23 + $0x160] sm:$0xff]  ;;  %418 = vmatpush1.msra.mxu0 %v261_v18  ;;  %v268_v16 = vld [vmem:[%s971_s23 + $0x1b8] sm:$0xff] }
  0x19   : > { %v386_v21 = vld [vmem:[%s971_s23 + $0x568] sm:$0xff]  ;;  %v385_v23 = vld [vmem:[%s971_s23 + $0x560] sm:$0xff]  ;;  %489 = vmatpush1.msra.mxu1 %v389_v19  ;;  %419 = vmatprep.subr.mxu0 %v258_v20  ;;  %v267_v18 = vld [vmem:[%s971_s23 + $0x1b0] sm:$0xff] }
  0x1a   : > { %v254_v24 = vld [vmem:[%s971_s23 + $0x148] sm:$0xff]  ;;  %490 = vmatprep.subr.mxu1 %v386_v21  ;;  %v253_v26 = vld [vmem:[%s971_s23 + $0x140] sm:$0xff]  ;;  %420 = vmatpush1.msra.mxu0 %v257_v22  ;;  %v264_v20 = vld [vmem:[%s971_s23 + $0x198] sm:$0xff] }
  0x1b   : > { %v382_v25 = vld [vmem:[%s971_s23 + $0x548] sm:$0xff]  ;;  %v381_v27 = vld [vmem:[%s971_s23 + $0x540] sm:$0xff]  ;;  %491 = vmatpush1.msra.mxu1 %v385_v23  ;;  %421 = vmatprep.subr.mxu0 %v254_v24  ;;  %v263_v22 = vld [vmem:[%s971_s23 + $0x190] sm:$0xff] }
  0x1c   : > { %v250_v28 = vld [vmem:[%s971_s23 + $0x128] sm:$0xff]  ;;  %492 = vmatprep.subr.mxu1 %v382_v25  ;;  %v249_v30 = vld [vmem:[%s971_s23 + $0x120] sm:$0xff]  ;;  %422 = vmatpush1.msra.mxu0 %v253_v26  ;;  %v260_v24 = vld [vmem:[%s971_s23 + $0x178] sm:$0xff] }
  0x1d   : > { %v378_v29 = vld [vmem:[%s971_s23 + $0x528] sm:$0xff]  ;;  %v377_v31 = vld [vmem:[%s971_s23 + $0x520] sm:$0xff]  ;;  %493 = vmatpush1.msra.mxu1 %v381_v27  ;;  %423 = vmatprep.subr.mxu0 %v250_v28  ;;  %v259_v26 = vld [vmem:[%s971_s23 + $0x170] sm:$0xff] }
  0x1e   : > { %v246_v32 = vld [vmem:[%s971_s23 + $0x108] sm:$0xff]  ;;  %494 = vmatprep.subr.mxu1 %v378_v29  ;;  %v245_v34 = vld [vmem:[%s971_s23 + $0x100] sm:$0xff]  ;;  %424 = vmatpush1.msra.mxu0 %v249_v30  ;;  %v256_v28 = vld [vmem:[%s971_s23 + $0x158] sm:$0xff] }
  0x1f   : > { %v374_v33 = vld [vmem:[%s971_s23 + $0x508] sm:$0xff]  ;;  %v373_v35 = vld [vmem:[%s971_s23 + $0x500] sm:$0xff]  ;;  %495 = vmatpush1.msra.mxu1 %v377_v31  ;;  %425 = vmatprep.subr.mxu0 %v246_v32  ;;  %v255_v30 = vld [vmem:[%s971_s23 + $0x150] sm:$0xff] }
  0x20   : > { %v242_v36 = vld [vmem:[%s971_s23 + $0xe8] sm:$0xff]  ;;  %496 = vmatprep.subr.mxu1 %v374_v33  ;;  %v241_v38 = vld [vmem:[%s971_s23 + $0xe0] sm:$0xff]  ;;  %426 = vmatpush1.msra.mxu0 %v245_v34  ;;  %v252_v32 = vld [vmem:[%s971_s23 + $0x138] sm:$0xff] }
  0x21   : > { %v370_v37 = vld [vmem:[%s971_s23 + $0x4e8] sm:$0xff]  ;;  %v369_v39 = vld [vmem:[%s971_s23 + $0x4e0] sm:$0xff]  ;;  %497 = vmatpush1.msra.mxu1 %v373_v35  ;;  %427 = vmatprep.subr.mxu0 %v242_v36  ;;  %v251_v34 = vld [vmem:[%s971_s23 + $0x130] sm:$0xff] }
  0x22   : > { %v238_v40 = vld [vmem:[%s971_s23 + $0xc8] sm:$0xff]  ;;  %498 = vmatprep.subr.mxu1 %v370_v37  ;;  %v237_v42 = vld [vmem:[%s971_s23 + $0xc0] sm:$0xff]  ;;  %428 = vmatpush1.msra.mxu0 %v241_v38  ;;  %v248_v36 = vld [vmem:[%s971_s23 + $0x118] sm:$0xff] }
  0x23   : > { %v366_v41 = vld [vmem:[%s971_s23 + $0x4c8] sm:$0xff]  ;;  %v365_v43 = vld [vmem:[%s971_s23 + $0x4c0] sm:$0xff]  ;;  %499 = vmatpush1.msra.mxu1 %v369_v39  ;;  %429 = vmatprep.subr.mxu0 %v238_v40  ;;  %v247_v38 = vld [vmem:[%s971_s23 + $0x110] sm:$0xff] }
  0x24   : > { %v234_v44 = vld [vmem:[%s971_s23 + $0xa8] sm:$0xff]  ;;  %500 = vmatprep.subr.mxu1 %v366_v41  ;;  %v233_v46 = vld [vmem:[%s971_s23 + $0xa0] sm:$0xff]  ;;  %430 = vmatpush1.msra.mxu0 %v237_v42  ;;  %v244_v40 = vld [vmem:[%s971_s23 + $0xf8] sm:$0xff] }
  0x25   : > { %v362_v45 = vld [vmem:[%s971_s23 + $0x4a8] sm:$0xff]  ;;  %v361_v47 = vld [vmem:[%s971_s23 + $0x4a0] sm:$0xff]  ;;  %501 = vmatpush1.msra.mxu1 %v365_v43  ;;  %431 = vmatprep.subr.mxu0 %v234_v44  ;;  %v243_v42 = vld [vmem:[%s971_s23 + $0xf0] sm:$0xff] }
  0x26   : > { %v230_v48 = vld [vmem:[%s971_s23 + $0x88] sm:$0xff]  ;;  %502 = vmatprep.subr.mxu1 %v362_v45  ;;  %v229_v50 = vld [vmem:[%s971_s23 + $0x80] sm:$0xff]  ;;  %432 = vmatpush1.msra.mxu0 %v233_v46  ;;  %v240_v44 = vld [vmem:[%s971_s23 + $0xd8] sm:$0xff] }
  0x27   : > { %v358_v49 = vld [vmem:[%s971_s23 + $0x488] sm:$0xff]  ;;  %v357_v51 = vld [vmem:[%s971_s23 + $0x480] sm:$0xff]  ;;  %503 = vmatpush1.msra.mxu1 %v361_v47  ;;  %433 = vmatprep.subr.mxu0 %v230_v48  ;;  %v239_v46 = vld [vmem:[%s971_s23 + $0xd0] sm:$0xff] }
  0x28   : > { %v226_v52 = vld [vmem:[%s971_s23 + $0x68] sm:$0xff]  ;;  %504 = vmatprep.subr.mxu1 %v358_v49  ;;  %v225_v54 = vld [vmem:[%s971_s23 + $0x60] sm:$0xff]  ;;  %434 = vmatpush1.msra.mxu0 %v229_v50  ;;  %v236_v48 = vld [vmem:[%s971_s23 + $0xb8] sm:$0xff] }
  0x29   : > { %v354_v53 = vld [vmem:[%s971_s23 + $0x468] sm:$0xff]  ;;  %v353_v55 = vld [vmem:[%s971_s23 + $0x460] sm:$0xff]  ;;  %505 = vmatpush1.msra.mxu1 %v357_v51  ;;  %435 = vmatprep.subr.mxu0 %v226_v52  ;;  %v235_v50 = vld [vmem:[%s971_s23 + $0xb0] sm:$0xff] }
  0x2a   : > { %v222_v56 = vld [vmem:[%s971_s23 + $0x48] sm:$0xff]  ;;  %506 = vmatprep.subr.mxu1 %v354_v53  ;;  %v221_v58 = vld [vmem:[%s971_s23 + $0x40] sm:$0xff]  ;;  %436 = vmatpush1.msra.mxu0 %v225_v54  ;;  %v232_v52 = vld [vmem:[%s971_s23 + $0x98] sm:$0xff] }
  0x2b   : > { %v350_v57 = vld [vmem:[%s971_s23 + $0x448] sm:$0xff]  ;;  %v349_v59 = vld [vmem:[%s971_s23 + $0x440] sm:$0xff]  ;;  %507 = vmatpush1.msra.mxu1 %v353_v55  ;;  %437 = vmatprep.subr.mxu0 %v222_v56  ;;  %v231_v54 = vld [vmem:[%s971_s23 + $0x90] sm:$0xff] }
  0x2c   : > { %v218_v60 = vld [vmem:[%s971_s23 + $0x28] sm:$0xff]  ;;  %508 = vmatprep.subr.mxu1 %v350_v57  ;;  %v217_v62 = vld [vmem:[%s971_s23 + $0x20] sm:$0xff]  ;;  %438 = vmatpush1.msra.mxu0 %v221_v58  ;;  %v228_v56 = vld [vmem:[%s971_s23 + $0x78] sm:$0xff] }
  0x2d   : > { %v346_v61 = vld [vmem:[%s971_s23 + $0x428] sm:$0xff]  ;;  %v345_v63 = vld [vmem:[%s971_s23 + $0x420] sm:$0xff]  ;;  %509 = vmatpush1.msra.mxu1 %v349_v59  ;;  %439 = vmatprep.subr.mxu0 %v218_v60  ;;  %v227_v58 = vld [vmem:[%s971_s23 + $0x70] sm:$0xff] }
  0x2e   : > { %v214_v2 = vld [vmem:[%s971_s23 + $0x8] sm:$0xff]  ;;  %510 = vmatprep.subr.mxu1 %v346_v61  ;;  %v213_v4 = vld [vmem:[%s971_s23] sm:$0xff]  ;;  %440 = vmatpush1.msra.mxu0 %v217_v62  ;;  %v224_v60 = vld [vmem:[%s971_s23 + $0x58] sm:$0xff] }
  0x2f   : > { %v342_v3 = vld [vmem:[%s971_s23 + $0x408] sm:$0xff]  ;;  %v341_v5 = vld [vmem:[%s971_s23 + $0x400] sm:$0xff]  ;;  %511 = vmatpush1.msra.mxu1 %v345_v63  ;;  %441 = vmatprep.subr.mxu0 %v214_v2  ;;  %v223_v62 = vld [vmem:[%s971_s23 + $0x50] sm:$0xff] }
  0x30   : > { %v338_v6 = vld [vmem:[%s971_s23 + $0x3e8] sm:$0xff]  ;;  %512 = vmatprep.subr.mxu1 %v342_v3  ;;  %v337_v9 = vld [vmem:[%s971_s23 + $0x3e0] sm:$0xff]  ;;  %442 = vmatpush1.msra.mxu0 %v213_v4  ;;  %v220_v2 = vld [vmem:[%s971_s23 + $0x38] sm:$0xff] }
  0x31   : > { %513 = vmatpush1.msra.mxu1 %v341_v5  ;;  %v334_v11 = vld [vmem:[%s971_s23 + $0x3c8] sm:$0xff]  ;;  %443 = vmatprep.subr.mxu0 %v338_v6  ;;  %v333_v13 = vld [vmem:[%s971_s23 + $0x3c0] sm:$0xff]  ;;  %v219_v4 = vld [vmem:[%s971_s23 + $0x30] sm:$0xff] }
  0x32   : > { %547 = vmatmul.mubr.f32.vlgmr.msra.gmra.mxu1 %v1041_v7  ;;  %553 = vmatprep.subr.mxu1 %v276_v8  ;;  %v330_v15 = vld [vmem:[%s971_s23 + $0x3a8] sm:$0xff]  ;;  %v329_v17 = vld [vmem:[%s971_s23 + $0x3a0] sm:$0xff]  ;;  %v216_v6 = vld [vmem:[%s971_s23 + $0x18] sm:$0xff] }
  0x33   : > { %444 = vmatpush2.msra.mxu0 %v337_v9  ;;  %554 = vmatpush1.msra.mxu1 %v275_v10  ;;  %v326_v19 = vld [vmem:[%s971_s23 + $0x388] sm:$0xff]  ;;  %v325_v21 = vld [vmem:[%s971_s23 + $0x380] sm:$0xff]  ;;  %v215_v9 = vld [vmem:[%s971_s23 + $0x10] sm:$0xff] }
  0x34   : > { %445 = vmatprep.subr.mxu0 %v334_v11  ;;  %555 = vmatprep.subr.mxu1 %v272_v12  ;;  %v322_v23 = vld [vmem:[%s971_s23 + $0x368] sm:$0xff]  ;;  %v321_v25 = vld [vmem:[%s971_s23 + $0x360] sm:$0xff]  ;;  %v340_v11 = vld [vmem:[%s971_s23 + $0x3f8] sm:$0xff] }
  0x35   : > { %446 = vmatpush2.msra.mxu0 %v333_v13  ;;  %556 = vmatpush1.msra.mxu1 %v271_v14  ;;  %v318_v27 = vld [vmem:[%s971_s23 + $0x348] sm:$0xff]  ;;  %v317_v29 = vld [vmem:[%s971_s23 + $0x340] sm:$0xff]  ;;  %v404_v12 = vld [vmem:[%s971_s23 + $0x5f8] sm:$0xff] }
  0x36   : > { %447 = vmatprep.subr.mxu0 %v330_v15  ;;  %557 = vmatprep.subr.mxu1 %v268_v16  ;;  %v314_v31 = vld [vmem:[%s971_s23 + $0x328] sm:$0xff]  ;;  %v313_v33 = vld [vmem:[%s971_s23 + $0x320] sm:$0xff]  ;;  %v339_v13 = vld [vmem:[%s971_s23 + $0x3f0] sm:$0xff] }
  0x37   : > { %448 = vmatpush2.msra.mxu0 %v329_v17  ;;  %558 = vmatpush1.msra.mxu1 %v267_v18  ;;  %v310_v35 = vld [vmem:[%s971_s23 + $0x308] sm:$0xff]  ;;  %v309_v37 = vld [vmem:[%s971_s23 + $0x300] sm:$0xff]  ;;  %v403_v14 = vld [vmem:[%s971_s23 + $0x5f0] sm:$0xff] }
  0x38   : > { %449 = vmatprep.subr.mxu0 %v326_v19  ;;  %559 = vmatprep.subr.mxu1 %v264_v20  ;;  %v306_v39 = vld [vmem:[%s971_s23 + $0x2e8] sm:$0xff]  ;;  %v305_v41 = vld [vmem:[%s971_s23 + $0x2e0] sm:$0xff]  ;;  %v336_v15 = vld [vmem:[%s971_s23 + $0x3d8] sm:$0xff] }
  0x39   : > { %450 = vmatpush2.msra.mxu0 %v325_v21  ;;  %560 = vmatpush1.msra.mxu1 %v263_v22  ;;  %v302_v43 = vld [vmem:[%s971_s23 + $0x2c8] sm:$0xff]  ;;  %v301_v45 = vld [vmem:[%s971_s23 + $0x2c0] sm:$0xff]  ;;  %v400_v16 = vld [vmem:[%s971_s23 + $0x5d8] sm:$0xff] }
  0x3a   : > { %451 = vmatprep.subr.mxu0 %v322_v23  ;;  %561 = vmatprep.subr.mxu1 %v260_v24  ;;  %v298_v47 = vld [vmem:[%s971_s23 + $0x2a8] sm:$0xff]  ;;  %v297_v49 = vld [vmem:[%s971_s23 + $0x2a0] sm:$0xff]  ;;  %v335_v17 = vld [vmem:[%s971_s23 + $0x3d0] sm:$0xff] }
  0x3b   : > { %452 = vmatpush2.msra.mxu0 %v321_v25  ;;  %562 = vmatpush1.msra.mxu1 %v259_v26  ;;  %v294_v51 = vld [vmem:[%s971_s23 + $0x288] sm:$0xff]  ;;  %v293_v53 = vld [vmem:[%s971_s23 + $0x280] sm:$0xff]  ;;  %v399_v18 = vld [vmem:[%s971_s23 + $0x5d0] sm:$0xff] }
  0x3c   : > { %453 = vmatprep.subr.mxu0 %v318_v27  ;;  %563 = vmatprep.subr.mxu1 %v256_v28  ;;  %v290_v55 = vld [vmem:[%s971_s23 + $0x268] sm:$0xff]  ;;  %v289_v57 = vld [vmem:[%s971_s23 + $0x260] sm:$0xff]  ;;  %v332_v19 = vld [vmem:[%s971_s23 + $0x3b8] sm:$0xff] }
  0x3d   : > { %454 = vmatpush2.msra.mxu0 %v317_v29  ;;  %564 = vmatpush1.msra.mxu1 %v255_v30  ;;  %v286_v59 = vld [vmem:[%s971_s23 + $0x248] sm:$0xff]  ;;  %v285_v61 = vld [vmem:[%s971_s23 + $0x240] sm:$0xff]  ;;  %v396_v20 = vld [vmem:[%s971_s23 + $0x5b8] sm:$0xff] }
  0x3e   : > { %455 = vmatprep.subr.mxu0 %v314_v31  ;;  %565 = vmatprep.subr.mxu1 %v252_v32  ;;  %v282_v63 = vld [vmem:[%s971_s23 + $0x228] sm:$0xff]  ;;  %v281_v3 = vld [vmem:[%s971_s23 + $0x220] sm:$0xff]  ;;  %v331_v21 = vld [vmem:[%s971_s23 + $0x3b0] sm:$0xff] }
  0x3f   : > { %456 = vmatpush2.msra.mxu0 %v313_v33  ;;  %566 = vmatpush1.msra.mxu1 %v251_v34  ;;  %v278_v5 = vld [vmem:[%s971_s23 + $0x208] sm:$0xff]  ;;  %v277_v8 = vld [vmem:[%s971_s23 + $0x200] sm:$0xff]  ;;  %v395_v22 = vld [vmem:[%s971_s23 + $0x5b0] sm:$0xff] }
  0x40   : > { %457 = vmatprep.subr.mxu0 %v310_v35  ;;  %567 = vmatprep.subr.mxu1 %v248_v36  ;;  %v1110_v10 = vld [vmem:[%s1195_s1] sm:$0xff]  ;;  %v328_v23 = vld [vmem:[%s971_s23 + $0x398] sm:$0xff]  ;;  %v327_v25 = vld [vmem:[%s971_s23 + $0x390] sm:$0xff] }
  0x41   : > { %458 = vmatpush2.msra.mxu0 %v309_v37  ;;  %568 = vmatpush1.msra.mxu1 %v247_v38  ;;  %v392_v24 = vld [vmem:[%s971_s23 + $0x598] sm:$0xff]  ;;  %v391_v26 = vld [vmem:[%s971_s23 + $0x590] sm:$0xff] }
  0x42   : > { %459 = vmatprep.subr.mxu0 %v306_v39  ;;  %569 = vmatprep.subr.mxu1 %v244_v40  ;;  %v324_v27 = vld [vmem:[%s971_s23 + $0x378] sm:$0xff]  ;;  %v323_v29 = vld [vmem:[%s971_s23 + $0x370] sm:$0xff] }
  0x43   : > { %460 = vmatpush2.msra.mxu0 %v305_v41  ;;  %570 = vmatpush1.msra.mxu1 %v243_v42  ;;  %v388_v28 = vld [vmem:[%s971_s23 + $0x578] sm:$0xff]  ;;  %v387_v30 = vld [vmem:[%s971_s23 + $0x570] sm:$0xff] }
  0x44   : > { %461 = vmatprep.subr.mxu0 %v302_v43  ;;  %571 = vmatprep.subr.mxu1 %v240_v44  ;;  %v320_v31 = vld [vmem:[%s971_s23 + $0x358] sm:$0xff]  ;;  %v319_v33 = vld [vmem:[%s971_s23 + $0x350] sm:$0xff] }
  0x45   : > { %462 = vmatpush2.msra.mxu0 %v301_v45  ;;  %572 = vmatpush1.msra.mxu1 %v239_v46  ;;  %v384_v32 = vld [vmem:[%s971_s23 + $0x558] sm:$0xff]  ;;  %v383_v34 = vld [vmem:[%s971_s23 + $0x550] sm:$0xff] }
  0x46   : > { %463 = vmatprep.subr.mxu0 %v298_v47  ;;  %573 = vmatprep.subr.mxu1 %v236_v48  ;;  %v316_v35 = vld [vmem:[%s971_s23 + $0x338] sm:$0xff]  ;;  %v315_v37 = vld [vmem:[%s971_s23 + $0x330] sm:$0xff] }
  0x47   : > { %464 = vmatpush2.msra.mxu0 %v297_v49  ;;  %574 = vmatpush1.msra.mxu1 %v235_v50  ;;  %v380_v36 = vld [vmem:[%s971_s23 + $0x538] sm:$0xff]  ;;  %v379_v38 = vld [vmem:[%s971_s23 + $0x530] sm:$0xff] }
  0x48   : > { %465 = vmatprep.subr.mxu0 %v294_v51  ;;  %575 = vmatprep.subr.mxu1 %v232_v52  ;;  %v312_v39 = vld [vmem:[%s971_s23 + $0x318] sm:$0xff]  ;;  %v311_v41 = vld [vmem:[%s971_s23 + $0x310] sm:$0xff] }
  0x49   : > { %466 = vmatpush2.msra.mxu0 %v293_v53  ;;  %576 = vmatpush1.msra.mxu1 %v231_v54  ;;  %v376_v40 = vld [vmem:[%s971_s23 + $0x518] sm:$0xff]  ;;  %v375_v42 = vld [vmem:[%s971_s23 + $0x510] sm:$0xff] }
  0x4a   : > { %467 = vmatprep.subr.mxu0 %v290_v55  ;;  %577 = vmatprep.subr.mxu1 %v228_v56  ;;  %v308_v43 = vld [vmem:[%s971_s23 + $0x2f8] sm:$0xff]  ;;  %v307_v45 = vld [vmem:[%s971_s23 + $0x2f0] sm:$0xff] }
  0x4b   : > { %468 = vmatpush2.msra.mxu0 %v289_v57  ;;  %578 = vmatpush1.msra.mxu1 %v227_v58  ;;  %v372_v44 = vld [vmem:[%s971_s23 + $0x4f8] sm:$0xff]  ;;  %v371_v46 = vld [vmem:[%s971_s23 + $0x4f0] sm:$0xff] }
  0x4c   : > { %469 = vmatprep.subr.mxu0 %v286_v59  ;;  %579 = vmatprep.subr.mxu1 %v224_v60  ;;  %v304_v47 = vld [vmem:[%s971_s23 + $0x2d8] sm:$0xff]  ;;  %v303_v49 = vld [vmem:[%s971_s23 + $0x2d0] sm:$0xff] }
  0x4d   : > { %470 = vmatpush2.msra.mxu0 %v285_v61  ;;  %580 = vmatpush1.msra.mxu1 %v223_v62  ;;  %v368_v48 = vld [vmem:[%s971_s23 + $0x4d8] sm:$0xff]  ;;  %v367_v50 = vld [vmem:[%s971_s23 + $0x4d0] sm:$0xff] }
  0x4e   : > { %471 = vmatprep.subr.mxu0 %v282_v63  ;;  %581 = vmatprep.subr.mxu1 %v220_v2  ;;  %v300_v51 = vld [vmem:[%s971_s23 + $0x2b8] sm:$0xff]  ;;  %v299_v53 = vld [vmem:[%s971_s23 + $0x2b0] sm:$0xff] }
  0x4f   : > { %472 = vmatpush2.msra.mxu0 %v281_v3  ;;  %582 = vmatpush1.msra.mxu1 %v219_v4  ;;  %v364_v52 = vld [vmem:[%s971_s23 + $0x4b8] sm:$0xff]  ;;  %v363_v54 = vld [vmem:[%s971_s23 + $0x4b0] sm:$0xff] }
  0x50   : > { %473 = vmatprep.subr.mxu0 %v278_v5  ;;  %583 = vmatprep.subr.mxu1 %v216_v6  ;;  %v296_v55 = vld [vmem:[%s971_s23 + $0x298] sm:$0xff]  ;;  %v295_v57 = vld [vmem:[%s971_s23 + $0x290] sm:$0xff] }
  0x51   : > { %474 = vmatpush2.msra.mxu0 %v277_v8  ;;  %584 = vmatpush1.msra.mxu1 %v215_v9  ;;  %v360_v56 = vld [vmem:[%s971_s23 + $0x498] sm:$0xff]  ;;  %v359_v58 = vld [vmem:[%s971_s23 + $0x490] sm:$0xff] }
  0x52   : > { %476 = vmatmul.mubr.f32.vlgmr.msra.gmra.mxu0 %v1110_v10  ;;  %585 = vmatprep.subr.mxu1 %v340_v11  ;;  %v292_v59 = vld [vmem:[%s971_s23 + $0x278] sm:$0xff]  ;;  %v291_v61 = vld [vmem:[%s971_s23 + $0x270] sm:$0xff] }
  0x53   : > { %624 = vmatprep.subr.mxu0 %v404_v12  ;;  %586 = vmatpush2.msra.mxu1 %v339_v13  ;;  %v356_v60 = vld [vmem:[%s971_s23 + $0x478] sm:$0xff]  ;;  %v355_v62 = vld [vmem:[%s971_s23 + $0x470] sm:$0xff] }
  0x54   : > { %625 = vmatpush1.msra.mxu0 %v403_v14  ;;  %587 = vmatprep.subr.mxu1 %v336_v15  ;;  %v288_v63 = vld [vmem:[%s971_s23 + $0x258] sm:$0xff]  ;;  %v287_v3 = vld [vmem:[%s971_s23 + $0x250] sm:$0xff] }
  0x55   : > { %626 = vmatprep.subr.mxu0 %v400_v16  ;;  %588 = vmatpush2.msra.mxu1 %v335_v17  ;;  %v352_v2 = vld [vmem:[%s971_s23 + $0x458] sm:$0xff]  ;;  %v351_v4 = vld [vmem:[%s971_s23 + $0x450] sm:$0xff] }
  0x56   : > { %627 = vmatpush1.msra.mxu0 %v399_v18  ;;  %589 = vmatprep.subr.mxu1 %v332_v19  ;;  %v284_v5 = vld [vmem:[%s971_s23 + $0x238] sm:$0xff]  ;;  %v283_v8 = vld [vmem:[%s971_s23 + $0x230] sm:$0xff] }
  0x57   : > { %628 = vmatprep.subr.mxu0 %v396_v20  ;;  %590 = vmatpush2.msra.mxu1 %v331_v21  ;;  %v348_v6 = vld [vmem:[%s971_s23 + $0x438] sm:$0xff]  ;;  %v347_v9 = vld [vmem:[%s971_s23 + $0x430] sm:$0xff] }
  0x58   : > { %629 = vmatpush1.msra.mxu0 %v395_v22  ;;  %591 = vmatprep.subr.mxu1 %v328_v23  ;;  %v280_v11 = vld [vmem:[%s971_s23 + $0x218] sm:$0xff]  ;;  %v279_v13 = vld [vmem:[%s971_s23 + $0x210] sm:$0xff] }
  0x59   : > { %630 = vmatprep.subr.mxu0 %v392_v24  ;;  %592 = vmatpush2.msra.mxu1 %v327_v25  ;;  %v344_v12 = vld [vmem:[%s971_s23 + $0x418] sm:$0xff]  ;;  %v343_v14 = vld [vmem:[%s971_s23 + $0x410] sm:$0xff] }
  0x5a   : > { %631 = vmatpush1.msra.mxu0 %v391_v26  ;;  %593 = vmatprep.subr.mxu1 %v324_v27 }
  0x5b   : > { %632 = vmatprep.subr.mxu0 %v388_v28  ;;  %594 = vmatpush2.msra.mxu1 %v323_v29 }
  0x5c   : > { %633 = vmatpush1.msra.mxu0 %v387_v30  ;;  %595 = vmatprep.subr.mxu1 %v320_v31 }
  0x5d   : > { %634 = vmatprep.subr.mxu0 %v384_v32  ;;  %596 = vmatpush2.msra.mxu1 %v319_v33 }
  0x5e   : > { %635 = vmatpush1.msra.mxu0 %v383_v34  ;;  %597 = vmatprep.subr.mxu1 %v316_v35 }
  0x5f   : > { %636 = vmatprep.subr.mxu0 %v380_v36  ;;  %598 = vmatpush2.msra.mxu1 %v315_v37 }
  0x60   : > { %637 = vmatpush1.msra.mxu0 %v379_v38  ;;  %599 = vmatprep.subr.mxu1 %v312_v39 }
  0x61   : > { %638 = vmatprep.subr.mxu0 %v376_v40  ;;  %600 = vmatpush2.msra.mxu1 %v311_v41 }
  0x62   : > { %639 = vmatpush1.msra.mxu0 %v375_v42  ;;  %601 = vmatprep.subr.mxu1 %v308_v43 }
  0x63   : > { %640 = vmatprep.subr.mxu0 %v372_v44  ;;  %602 = vmatpush2.msra.mxu1 %v307_v45 }
  0x64   : > { %641 = vmatpush1.msra.mxu0 %v371_v46  ;;  %603 = vmatprep.subr.mxu1 %v304_v47 }
  0x65   : > { %642 = vmatprep.subr.mxu0 %v368_v48  ;;  %604 = vmatpush2.msra.mxu1 %v303_v49 }
  0x66   : > { %643 = vmatpush1.msra.mxu0 %v367_v50  ;;  %605 = vmatprep.subr.mxu1 %v300_v51 }
  0x67   : > { %644 = vmatprep.subr.mxu0 %v364_v52  ;;  %606 = vmatpush2.msra.mxu1 %v299_v53 }
  0x68   : > { %645 = vmatpush1.msra.mxu0 %v363_v54  ;;  %607 = vmatprep.subr.mxu1 %v296_v55 }
  0x69   : > { %646 = vmatprep.subr.mxu0 %v360_v56  ;;  %608 = vmatpush2.msra.mxu1 %v295_v57 }
  0x6a   : > { %647 = vmatpush1.msra.mxu0 %v359_v58  ;;  %609 = vmatprep.subr.mxu1 %v292_v59 }
  0x6b   : > { %648 = vmatprep.subr.mxu0 %v356_v60  ;;  %610 = vmatpush2.msra.mxu1 %v291_v61 }
  0x6c   : > { %649 = vmatpush1.msra.mxu0 %v355_v62  ;;  %611 = vmatprep.subr.mxu1 %v288_v63 }
  0x6d   : > { %650 = vmatprep.subr.mxu0 %v352_v2  ;;  %612 = vmatpush2.msra.mxu1 %v287_v3 }
  0x6e   : > { %651 = vmatpush1.msra.mxu0 %v351_v4  ;;  %613 = vmatprep.subr.mxu1 %v284_v5 }
  0x6f   : > { %652 = vmatprep.subr.mxu0 %v348_v6  ;;  %614 = vmatpush2.msra.mxu1 %v283_v8 }
  0x70   : > { %653 = vmatpush1.msra.mxu0 %v347_v9  ;;  %615 = vmatprep.subr.mxu1 %v280_v11 }
  0x71   : > { %654 = vmatprep.subr.mxu0 %v344_v12  ;;  %616 = vmatpush2.msra.mxu1 %v279_v13 }
  0x72   : > { %617 = vmatprep.mubr.f32.mxu1 %v958_v0  ;;  %655 = vmatpush1.msra.mxu0 %v343_v14 }
  0x73   : > { %688 = vmatprep.mubr.f32.mxu0 %v915_v1  ;;  %618 = vmatmul.mubr.f32.vlgmr.msra.gmra.mxu1 %v1110_v10 }
  0x74   : > { %689 = vmatmul.mubr.f32.vlgmr.msra.gmra.mxu0 %v1041_v7 }
  0x8a   : > { %v409_v15 = vpop.permute.xlu0 %408 }
  0xf2   : > { %v548_v16 = vpop.f32.mrf.mxu1 }
  0xf4   : > { %v550_v22 = vpop.f32.mrf.mxu1 }
 0x112   : > { %v477_v17 = vpop.f32.mrf.mxu0 }
 0x113   : > { %v478_v18 = vadd.f32 %v477_v17, %v409_v15 }
 0x114   : > { %v479_v19 = vpop.f32.mrf.mxu0 }
 0x115   : > { %v549_v20 = vadd.f32 %v548_v16, %v478_v18  ;;  %v480_v21 = vadd.f32 %v479_v19, %v409_v15 }
 0x117   : > { %v840_v23 = vmul.f32 -1.442695, %v549_v20  ;;  %v551_v24 = vadd.f32 %v550_v22, %v480_v21 }
 0x119   : > { %875 = vpow2.f32 %v840_v23  ;;  %v841_v25 = vmul.f32 -1.442695, %v551_v24 }
 0x11b   : > { %877 = vpow2.f32 %v841_v25 }
 0x126   : > { %v876_v0 = vpop.eup %875 }
 0x127   : > { %v707_v26 = vadd.f32 1.0, %v876_v0 }
 0x128   : > { %v878_v1 = vpop.eup %877 }
 0x129   : > { %879 = vrcp.f32 %v707_v26  ;;  %v708_v10 = vadd.f32 1.0, %v878_v1 }
 0x12b   : > { %881 = vrcp.f32 %v708_v10 }
 0x133   : > { %v619_v7 = vpop.f32.mrf.mxu1 }
 0x134   : > { %v690_v27 = vpop.f32.mrf.mxu0  ;;  %v620_v28 = vadd.f32 %v619_v7, %v409_v15 }
 0x135   : > { %v621_v30 = vpop.f32.mrf.mxu1 }
 0x136   : > { %v880_v29 = vpop.eup %879  ;;  %v691_v32 = vadd.f32 %v690_v27, %v620_v28  ;;  %v622_v33 = vadd.f32 %v621_v30, %v409_v15  ;;  %v692_v35 = vpop.f32.mrf.mxu0 }
 0x137   : > { %v723_v31 = vrot.slane %v880_v29, 4 }
 0x138   : > { %v882_v34 = vpop.eup %881  ;;  %v842_v37 = vmul.f32 -1.442695, %v691_v32  ;;  %v693_v38 = vadd.f32 %v692_v35, %v622_v33 }
 0x139   : > { %v724_v36 = vrot.slane %v882_v34, 4  ;;  %v731_v39 = vmul.f32 %v723_v31, %v549_v20 }
 0x13a   : > { %883 = vpow2.f32 %v842_v37  ;;  %v843_v41 = vmul.f32 -1.442695, %v693_v38 }
 0x13b   : > { %v732_v40 = vmul.f32 %v724_v36, %v551_v24 }
 0x13c   : > { %885 = vpow2.f32 %v843_v41 }
 0x13d   : > { %v739_v42 = vcombine.low %v731_v39, %v732_v40 }
 0x13f   : > { %743 = vst [vmem:[%s208_s4] sm:$0xff] %v739_v42 }
 0x147   : > { %v884_v43 = vpop.eup %883 }
 0x148   : > { %v709_v44 = vadd.f32 1.0, %v884_v43 }
 0x149   : > { %v886_v45 = vpop.eup %885 }
 0x14a   : > { %887 = vrcp.f32 %v709_v44  ;;  %v710_v46 = vadd.f32 1.0, %v886_v45 }
 0x14c   : > { %889 = vrcp.f32 %v710_v46 }
 0x157   : > { %v888_v47 = vpop.eup %887 }
 0x158   : > { %v725_v48 = vrot.slane %v888_v47, 4 }
 0x159   : > { %v890_v49 = vpop.eup %889 }
 0x15a   : > { %v726_v50 = vrot.slane %v890_v49, 4  ;;  %v733_v51 = vmul.f32 %v725_v48, %v691_v32 }
 0x15c   : > { %v734_v52 = vmul.f32 %v726_v50, %v693_v38 }
 0x15e   : > { %v740_v53 = vcombine.low %v733_v51, %v734_v52 }
 0x160   : > { %744 = vst [vmem:[%s208_s4 + $0x8] sm:$0xff] %v740_v53 }
 0x161 PF: > { %s13_s14 = sadd.s32 1, %s913_s14   ;;  %s1198_s12 = smov %s909_s13 }
 0x162   : > { %p10_p5 = scmp.ge.s32.totalorder %s13_s14, 4   ;;  %s1199_s13 = smov %s1201_s15 }
 0x164   :  { %12 = sbr.rel (!%p10_p5) target bundleno = 2 (0x2), region = 62 }

// kernel: upcond_forward.17
= control target key start
LH: loop header
LB: loop body
LE: loop exit
PB: predicated region body
PF: predicated region fallthrough
CT: control target
= control target key end

     0   :  { %s627_s12 = smov 0   ;;  %s629_s13 = smov 0   ;;  %s692_s0 = inlined_call_operand.vmem [shape: f32[2,40,512], index: 0, kind: input, shape index: {}]   ;;  %s693_s1 = inlined_call_operand.vmem [shape: f32[8,40], index: 1, kind: input, shape index: {}]   ;;  %s694_s2 = inlined_call_operand.vmem [shape: f32[8,1], index: 2, kind: input, shape index: {}]   ;;  %s695_s3 = inlined_call_operand.vmem [shape: f32[2,4,512], index: 3, kind: output, shape index: {}]  }
   0x1   :  { %s631_s14 = smov 0  }
   0x2 LB: > { %s25_s15 = sadd.s32 1, %s599_s13  ;;  %p524_p0 = scmp.ge.s32.totalorder %s603_s14, 1  ;;  %s603_s14 = sphi %s631_s14, %s13_s14   ;;  %s599_s13 = sphi %s629_s13, %s697_s13   ;;  %s595_s12 = sphi %s627_s12, %s696_s12  }
   0x3   : > { %p27_p1 = scmp.ge.s32.totalorder %s25_s15, 2  ;;  %p158_p2 = scmp.lt.s32.totalorder %s603_s14, 3 }
   0x5   : > { %s699_s15 = smov (%p27_p1, %s25_s15), 0  ;;  %p159_p3 = pnand %p524_p0, %p158_p2 }
   0x6   : > { %p191_p4 = scmp.lt.s32.totalorder (!%p159_p3), %s595_s12, 1 }
   0x7   : > { %162 = sbr.rel (%p159_p3) target bundleno = 264 (0x108), region = 32 }
   0xc   : > { %v231_v0 = vld [vmem:[%s694_s2] sm:$0xff]  ;;  %v605_v1 = vmov 0.0   ;;  %s701_s12 = smov (!%p191_p4, %s595_s12), 1  ;;  %v606_v2 = vmov 0   ;;  %vm237_vm0 = vcmask 326656  }
   0xd   : > { %305 = vmatprep.mubr.f32.mxu0 %v605_v1  ;;  %376 = vmatprep.mubr.f32.mxu1 %v605_v1  ;;  %s537_s18 = smul.u32 160, %s701_s12  ;;  %v210_v23 = vld [vmem:[%s693_s1] sm:$0xff]  ;;  %s536_s24 = sshll.u32 %s701_s12, 4 }
   0xe   : > { %564 = vset.pattern.permute.xlu0 %v606_v2  ;;  %s208_s27 = scalar_lea.vmem %s695_s3, %s536_s24 }
   0xf   : > { %234 = vperm.xlu0 %564, %v231_v0   ;;  %s654_s21 = scalar_lea.vmem %s692_s0, %s537_s18 }
  0x10   : > { %v228_v3 = vld [vmem:[%s654_s21 + $0x88] sm:$0xff]  ;;  %v230_v4 = vld [vmem:[%s654_s21 + $0x98] sm:$0xff]  ;;  %v227_v5 = vld [vmem:[%s654_s21 + $0x80] sm:$0xff] }
  0x11   : > { %263 = vmatprep.subr.mxu0 %v228_v3  ;;  %334 = vmatprep.subr.mxu1 %v230_v4  ;;  %v229_v6 = vld [vmem:[%s654_s21 + $0x90] sm:$0xff]  ;;  %v224_v7 = vld [vmem:[%s654_s21 + $0x68] sm:$0xff]  ;;  %v226_v8 = vld [vmem:[%s654_s21 + $0x78] sm:$0xff] }
  0x12   : > { %264 = vmatpush1.msra.mxu0 %v227_v5  ;;  %335 = vmatpush1.msra.mxu1 %v229_v6  ;;  %v223_v9 = vld [vmem:[%s654_s21 + $0x60] sm:$0xff]  ;;  %v225_v10 = vld [vmem:[%s654_s21 + $0x70] sm:$0xff]  ;;  %v220_v11 = vld [vmem:[%s654_s21 + $0x48] sm:$0xff] }
  0x13   : > { %265 = vmatprep.subr.mxu0 %v224_v7  ;;  %336 = vmatprep.subr.mxu1 %v226_v8  ;;  %v222_v12 = vld [vmem:[%s654_s21 + $0x58] sm:$0xff]  ;;  %v219_v13 = vld [vmem:[%s654_s21 + $0x40] sm:$0xff]  ;;  %v221_v14 = vld [vmem:[%s654_s21 + $0x50] sm:$0xff] }
  0x14   : > { %266 = vmatpush1.msra.mxu0 %v223_v9  ;;  %337 = vmatpush1.msra.mxu1 %v225_v10  ;;  %v216_v15 = vld [vmem:[%s654_s21 + $0x28] sm:$0xff]  ;;  %v218_v16 = vld [vmem:[%s654_s21 + $0x38] sm:$0xff]  ;;  %v215_v17 = vld [vmem:[%s654_s21 + $0x20] sm:$0xff] }
  0x15   : > { %267 = vmatprep.subr.mxu0 %v220_v11  ;;  %338 = vmatprep.subr.mxu1 %v222_v12  ;;  %v217_v18 = vld [vmem:[%s654_s21 + $0x30] sm:$0xff]  ;;  %v212_v19 = vld [vmem:[%s654_s21 + $0x8] sm:$0xff]  ;;  %v214_v20 = vld [vmem:[%s654_s21 + $0x18] sm:$0xff] }
  0x16   : > { %268 = vmatpush1.msra.mxu0 %v219_v13  ;;  %339 = vmatpush1.msra.mxu1 %v221_v14  ;;  %v211_v21 = vld [vmem:[%s654_s21] sm:$0xff]  ;;  %v213_v22 = vld [vmem:[%s654_s21 + $0x10] sm:$0xff] }
  0x17   : > { %269 = vmatprep.subr.mxu0 %v216_v15  ;;  %340 = vmatprep.subr.mxu1 %v218_v16 }
  0x18   : > { %270 = vmatpush1.msra.mxu0 %v215_v17  ;;  %341 = vmatpush1.msra.mxu1 %v217_v18 }
  0x19   : > { %271 = vmatprep.subr.mxu0 %v212_v19  ;;  %342 = vmatprep.subr.mxu1 %v214_v20 }
  0x1a   : > { %272 = vmatpush1.msra.mxu0 %v211_v21  ;;  %343 = vmatpush1.msra.mxu1 %v213_v22 }
  0x1b   : > { %528 = vmatmul.mubr.msk.f32.vlgmr.msra.gmra.mxu0 %vm237_vm0, %v210_v23  ;;  %529 = vmatmul.mubr.msk.f32.vlgmr.msra.gmra.mxu1 %vm237_vm0, %v210_v23 }
  0x8a   : > { %v235_v24 = vpop.permute.xlu0 %234 }
  0xdb   : > { %v307_v25 = vpop.f32.mrf.mxu0  ;;  %v378_v26 = vpop.f32.mrf.mxu1 }
  0xdc   : > { %v308_v27 = vadd.f32 %v307_v25, %v235_v24  ;;  %v379_v28 = vadd.f32 %v378_v26, %v235_v24 }
  0xdd   : > { %v309_v29 = vpop.f32.mrf.mxu0  ;;  %v380_v30 = vpop.f32.mrf.mxu1 }
  0xde   : > { %v530_v31 = vmul.f32 -1.442695, %v308_v27  ;;  %v532_v32 = vmul.f32 -1.442695, %v379_v28  ;;  %v310_v33 = vadd.f32 %v309_v29, %v235_v24  ;;  %v381_v34 = vadd.f32 %v380_v30, %v235_v24 }
  0xe0   : > { %565 = vpow2.f32 %v530_v31  ;;  %v531_v35 = vmul.f32 -1.442695, %v310_v33  ;;  %v533_v36 = vmul.f32 -1.442695, %v381_v34 }
  0xe1   : > { %567 = vpow2.f32 %v532_v32 }
  0xe2   : > { %569 = vpow2.f32 %v531_v35 }
  0xe3   : > { %571 = vpow2.f32 %v533_v36 }
  0xed   : > { %v566_v37 = vpop.eup %565 }
  0xee   : > { %v568_v38 = vpop.eup %567  ;;  %v395_v39 = vadd.f32 1.0, %v566_v37 }
  0xef   : > { %v570_v40 = vpop.eup %569  ;;  %v397_v41 = vadd.f32 1.0, %v568_v38 }
  0xf0   : > { %v572_v42 = vpop.eup %571  ;;  %573 = vrcp.f32 %v395_v39  ;;  %v396_v43 = vadd.f32 1.0, %v570_v40 }
  0xf1   : > { %575 = vrcp.f32 %v397_v41  ;;  %v398_v44 = vadd.f32 1.0, %v572_v42 }
  0xf2   : > { %577 = vrcp.f32 %v396_v43 }
  0xf3   : > { %579 = vrcp.f32 %v398_v44 }
  0xfd   : > { %v574_v45 = vpop.eup %573 }
  0xfe   : > { %v576_v46 = vpop.eup %575  ;;  %v411_v47 = vrot.slane %v574_v45, 4 }
  0xff   : > { %v578_v48 = vpop.eup %577  ;;  %v413_v49 = vrot.slane %v576_v46, 4 }
 0x100   : > { %v580_v50 = vpop.eup %579  ;;  %v412_v51 = vrot.slane %v578_v48, 4  ;;  %v419_v53 = vmul.f32 %v411_v47, %v308_v27 }
 0x101   : > { %v414_v52 = vrot.slane %v580_v50, 4  ;;  %v421_v55 = vmul.f32 %v413_v49, %v379_v28 }
 0x102   : > { %v420_v54 = vmul.f32 %v412_v51, %v310_v33 }
 0x103   : > { %v422_v56 = vmul.f32 %v414_v52, %v381_v34 }
 0x104   : > { %v427_v57 = vcombine.low %v419_v53, %v420_v54 }
 0x105   : > { %v428_v58 = vcombine.low %v421_v55, %v422_v56 }
 0x106   : > { %431 = vst [vmem:[%s208_s27] sm:$0xff] %v427_v57 }
 0x107   : > { %432 = vst [vmem:[%s208_s27 + $0x8] sm:$0xff] %v428_v58 }
 0x108 PF: > { %s13_s14 = sadd.s32 1, %s603_s14   ;;  %s696_s12 = smov %s599_s13 }
 0x109   : > { %p10_p5 = scmp.ge.s32.totalorder %s13_s14, 4   ;;  %s697_s13 = smov %s699_s15 }
 0x10b   :  { %12 = sbr.rel (!%p10_p5) target bundleno = 2 (0x2), region = 62 }

// kernel: upcond_forward.18
= control target key start
LH: loop header
LB: loop body
LE: loop exit
PB: predicated region body
PF: predicated region fallthrough
CT: control target
= control target key end

     0   :  { %11 = vsyncpa [#allocation3], 0  ;;  %s537_s0 = inlined_call_operand.vmem [shape: f32[2,4,512], index: 0, kind: input, shape index: {}]   ;;  %s538_s1 = inlined_call_operand.vmem [shape: f32[2,4,512], index: 1, kind: input, shape index: {}]   ;;  %s539_s2 = inlined_call_operand.vmem [shape: f32[1,4,1], index: 2, kind: input, shape index: {}]   ;;  %s540_s3 = inlined_call_operand.vmem [shape: f32[1,4,1], index: 3, kind: input, shape index: {}]   ;;  %s541_s4 = inlined_call_operand.vmem [shape: f32[3], index: 4, kind: input, shape index: {}]   ;;  %s542_s5 = inlined_call_operand.vmem [shape: f32[3], index: 5, kind: input, shape index: {}]   ;;  %s543_s6 = inlined_call_operand.vmem [shape: f32[2,4,512], index: 6, kind: output, shape index: {}]  }
   0x1   :  { %s27_s23 = sshll.u32 %s541_s4, 4  ;;  %s28_s23 = int_to_ptr.vmem [resolvable:$true] %s27_s23 }
   0x2   :  { %12 = vsyncpa [#allocation5], 0  ;;  %s37_s26 = sshll.u32 %s542_s5, 4  ;;  %s341_s27 = scalar_lea.vmem %s28_s23, 16  ;;  %s38_s26 = int_to_ptr.vmem [resolvable:$true] %s37_s26 }
   0x3   :  { %p342_p0 = scmp.ne.s32.totalorder %s28_s23, %s341_s27  ;;  %p346_p1 = scmp.lt.s32.totalorder %s28_s23, %s28_s23 }
   0x4   :  { %p347_p2 = scmp.lt.s32.totalorder %s341_s27, %s341_s27 }
   0x6   :  { %p348_p3 = por %p347_p2, %p346_p1 }
   0x8   :  { %p349_p4 = pnand %p348_p3, %p342_p0 }
   0xa   :  { %352 = shalt.err (!%p349_p4)
}
   0xb   :  { %s369_s28 = smov [#allocation2]   ;;  %s353_s29 = scalar_lea.vmem %s38_s26, 16 }
   0xc   :  { %30 = dma.vmem_to_smem %s28_s23, 16, %s369_s28, [#allocation3]  }
   0xd   :  { %p354_p5 = scmp.ne.s32.totalorder %s38_s26, %s353_s29  ;;  %p358_p6 = scmp.lt.s32.totalorder %s38_s26, %s38_s26 }
   0xe   :  { %p359_p7 = scmp.lt.s32.totalorder %s353_s29, %s353_s29 }
  0x10   :  { %p360_p8 = por %p359_p7, %p358_p6 }
  0x12   :  { %p361_p9 = pnand %p360_p8, %p354_p5 }
  0x14   :  { %364 = shalt.err (!%p361_p9)
}
  0x15   :  { %s370_s4 = smov [#allocation4]  }
  0x16   :  { %40 = dma.vmem_to_smem %s38_s26, 16, %s370_s4, [#allocation5]  }
  0x17   :  { %365 = dma.done.wait [#allocation3], 16  }
  0x18   :  { %366 = vsyncadd [#allocation3], 4294967280 }
  0x19   :  { %367 = dma.done.wait [#allocation5], 16  }
  0x1a   :  { %368 = vsyncadd [#allocation5], 4294967280 }
  0x1b   :  { %47 = sfence }
  0x1c   :  { %v417_v0 = vld [vmem:[%s538_s1] sm:$0xff]  ;;  %v422_v1 = vld [vmem:[%s538_s1 + $0x8] sm:$0xff]  ;;  %vm64_vm0 = vcmask 1043456   ;;  %v427_v2 = vld [vmem:[%s538_s1 + $0x10] sm:$0xff]  ;;  %v371_v23 = vmov 0   ;;  %v91_v26 = vlaneseq  ;;  %s467_s14 = sld [smem:[#allocation2 + $0x1]] }
  0x1d   :  { %v56_v3 = vcombine.high %v417_v0, %v417_v0  ;;  %v57_v4 = vcombine.high %v422_v1, %v422_v1  ;;  %v65_v5 = vsel %vm64_vm0, %v417_v0, 0.0  ;;  %v438_v6 = vld [vmem:[%s538_s1 + $0x18] sm:$0xff]  ;;  %v58_v7 = vcombine.high %v427_v2, %v427_v2  ;;  %v275_v22 = vld [vmem:[%s539_s2] sm:$0xf]  ;;  %331 = vset.pattern.permute.xlu0 %v371_v23  ;;  %332 = vset.pattern.permute.xlu1 %v371_v23  ;;  %s465_s2 = sld [smem:[#allocation2]] }
  0x1e   :  { %v74_v8 = vsel %vm64_vm0, %v427_v2, 0.0  ;;  %v68_v10 = vsel %vm64_vm0, %v422_v1, 0.0  ;;  %v59_v11 = vcombine.high %v438_v6, %v438_v6  ;;  %v77_v14 = vsel %vm64_vm0, %v438_v6, 0.0  ;;  %s477_s15 = sld [smem:[#allocation2 + $0x2]] }
  0x1f   :  { %v66_v9 = vsel %vm64_vm0, %v56_v3, 0.0  ;;  %v75_v13 = vsel %vm64_vm0, %v58_v7, 0.0  ;;  %v70_v15 = vsel %vm64_vm0, %v57_v4, 0.0  ;;  %v372_v24 = vmov 839922192   ;;  %s325_s18 = sld [smem:[#allocation4 + $0x1]] }
  0x20   :  { %v67_v12 = vadd.f32 %v66_v9, %v65_v5  ;;  %v76_v16 = vadd.f32 %v75_v13, %v74_v8  ;;  %v79_v19 = vsel %vm64_vm0, %v59_v11, 0.0  ;;  %v89_v25 = vunpack.c.l.s4 %v372_v24  ;;  %s326_s19 = sld [smem:[#allocation4 + $0x2]] }
  0x21   :  { %v92_v28 = vshrl.u32 %v91_v26, 7 }
  0x22   :  { %v69_v17 = vadd.f32 %v68_v10, %v67_v12  ;;  %v78_v18 = vadd.f32 %v77_v14, %v76_v16  ;;  %v90_v27 = vunpack.c.0.s8 %v89_v25  ;;  %v198_v61 = vstv %s467_s14 }
  0x23   :  { %v194_v60 = vstv %s465_s2 }
  0x24   :  { %v71_v20 = vadd.f32 %v70_v15, %v69_v17  ;;  %v80_v21 = vadd.f32 %v79_v19, %v78_v18  ;;  %v457_v29 = vsub.s32 %v90_v27, %v92_v28  ;;  %v204_v16 = vstv %s477_s15 }
  0x26   :  { %72 = vadd.xlane.f32.xlu0 %v71_v20 }
  0x2a   :  { %81 = vadd.xlane.f32.xlu0 %v80_v21 }
  0x40   :  { %278 = vperm.xlu0 %331, %v275_v22  }
  0xaf   :  { %v73_v30 = vpop.xlane.xlu0 %72 }
  0xb0   :  { %v459_v31 = vmul.f32 0.001953125, %v73_v30 }
  0xb2   :  { %v145_v32 = vsel %vm64_vm0, %v459_v31, 0.0  ;;  %v94_v33 = vrot.slane %v459_v31, %v457_v29  ;;  %v195_v18 = vmul.f32 %v194_v60, %v459_v31 }
  0xb3   :  { %v146_v34 = vrot.slane %v145_v32, 4  ;;  %v82_v35 = vpop.xlane.xlu0 %81 }
  0xb4   :  { %v469_v36 = vmul.f32 0.001953125, %v82_v35  ;;  %v104_v37 = vsub.f32 %v417_v0, %v94_v33  ;;  %v105_v38 = vsub.f32 %v422_v1, %v94_v33 }
  0xb5   :  { %v147_v39 = vadd.f32 %v146_v34, %v145_v32  ;;  %v296_v34 = vld [vmem:[%s540_s3] sm:$0xf]  ;;  %s208_s3 = sld [smem:[#allocation4]] }
  0xb6   :  { %v101_v40 = vrot.slane %v469_v36, %v457_v29  ;;  %v152_v41 = vsel %vm64_vm0, %v469_v36, 0.0  ;;  %v108_v42 = vmul.f32 %v104_v37, %v104_v37  ;;  %v109_v46 = vmul.f32 %v105_v38, %v105_v38 }
  0xb7   :  { %v148_v43 = vrot.slane %v147_v39, 2  ;;  %v153_v44 = vrot.slane %v152_v41, 4  ;;  %v186_v45 = vadd.f32 %v152_v41, %v145_v32  ;;  %v196_v27 = vmul.f32 %v194_v60, %v469_v36 }
  0xb8   :  { %v116_v47 = vcombine.high %v108_v42, %v108_v42  ;;  %v106_v48 = vsub.f32 %v427_v2, %v101_v40  ;;  %v107_v49 = vsub.f32 %v438_v6, %v101_v40  ;;  %v124_v52 = vsel %vm64_vm0, %v108_v42, 0.0 }
  0xb9   :  { %v149_v50 = vadd.f32 %v148_v43, %v147_v39  ;;  %v154_v51 = vadd.f32 %v153_v44, %v152_v41  ;;  %v117_v53 = vcombine.high %v109_v46, %v109_v46  ;;  %v127_v62 = vsel %vm64_vm0, %v109_v46, 0.0 }
  0xba   :  { %v125_v54 = vsel %vm64_vm0, %v116_v47, 0.0  ;;  %v110_v55 = vmul.f32 %v106_v48, %v106_v48  ;;  %v111_v56 = vmul.f32 %v107_v49, %v107_v49  ;;  %v188_v5 = vmul.f32 0.5, %v186_v45 }
  0xbb   :  { %v150_v57 = vrot.slane %v149_v50, 1  ;;  %v155_v58 = vrot.slane %v154_v51, 2  ;;  %v126_v59 = vadd.f32 %v125_v54, %v124_v52  ;;  %v129_v8 = vsel %vm64_vm0, %v117_v53, 0.0 }
  0xbc   :  { %v118_v63 = vcombine.high %v110_v55, %v110_v55  ;;  %v119_v9 = vcombine.high %v111_v56, %v111_v56  ;;  %v133_v10 = vsel %vm64_vm0, %v110_v55, 0.0  ;;  %v136_v17 = vsel %vm64_vm0, %v111_v56, 0.0 }
  0xbd   :  { %v151_v3 = vadd.f32 %v150_v57, %v149_v50  ;;  %v156_v4 = vadd.f32 %v155_v58, %v154_v51  ;;  %v128_v7 = vadd.f32 %v127_v62, %v126_v59  ;;  %v205_v25 = vmul.f32 %v204_v16, %v188_v5 }
  0xbe   :  { %v134_v11 = vsel %vm64_vm0, %v118_v63, 0.0  ;;  %v138_v22 = vsel %vm64_vm0, %v119_v9, 0.0  ;;  %v162_v37 = vmul.f32 %v459_v31, %v459_v31  ;;  %v163_v42 = vmul.f32 %v469_v36, %v469_v36 }
  0xbf   :  { %v160_v12 = vmul.f32 0.25, %v151_v3  ;;  %v157_v13 = vrot.slane %v156_v4, 1  ;;  %v130_v14 = vadd.f32 %v129_v8, %v128_v7  ;;  %v135_v15 = vadd.f32 %v134_v11, %v133_v10 }
  0xc0   :  { %v191_v51 = vmul.f32 %v188_v5, %v188_v5  ;;  %v213_v62 = vstv %s325_s18 }
  0xc1   :  { %v199_v19 = vmul.f32 %v198_v61, %v160_v12  ;;  %v158_v20 = vadd.f32 %v157_v13, %v156_v4  ;;  %131 = vadd.xlane.f32.xlu1 %v130_v14  ;;  %v137_v21 = vadd.f32 %v136_v17, %v135_v15  ;;  %v182_v58 = vmul.f32 %v160_v12, %v160_v12 }
  0xc2   :  { %v219_v4 = vstv %s326_s19 }
  0xc3   :  { %v201_v23 = vadd.f32 %v199_v19, %v195_v18  ;;  %v161_v24 = vmul.f32 0.25, %v158_v20  ;;  %v139_v26 = vadd.f32 %v138_v22, %v137_v21  ;;  %v279_v21 = vpop.permute.xlu0 %278 }
  0xc5   :  { %v200_v28 = vmul.f32 %v198_v61, %v161_v24  ;;  %v206_v30 = vadd.f32 %v205_v25, %v201_v23  ;;  %140 = vadd.xlane.f32.xlu1 %v139_v26  ;;  %v209_v61 = vstv %s208_s3  ;;  %v183_v9 = vmul.f32 %v161_v24, %v161_v24 }
  0xc7   :  { %v202_v32 = vadd.f32 %v200_v28, %v196_v27  ;;  %v231_v20 = vrot.slane %v206_v30, %v457_v29  ;;  %v286_v27 = vrot.slane %v279_v21, %v457_v29 }
  0xc9   :  { %v207_v33 = vadd.f32 %v205_v25, %v202_v32  ;;  %v241_v24 = vsub.f32 %v417_v0, %v231_v20  ;;  %v242_v25 = vsub.f32 %v422_v1, %v231_v20  ;;  %v272_v0 = vld [vmem:[%s537_s0 + $0x8] sm:$0xff] }
  0xcb   :  { %v238_v23 = vrot.slane %v207_v33, %v457_v29  ;;  %v271_v33 = vld [vmem:[%s537_s0] sm:$0xff] }
  0xcd   :  { %v244_v30 = vsub.f32 %v438_v6, %v238_v23  ;;  %v273_v6 = vld [vmem:[%s537_s0 + $0x10] sm:$0xff] }
  0xd6   :  { %299 = vperm.xlu1 %332, %v296_v34  }
 0x14a   :  { %v132_v35 = vpop.xlane.xlu1 %131 }
 0x14b   :  { %v143_v38 = vmul.f32 0.0019569471, %v132_v35 }
 0x14d   :  { %v164_v39 = vadd.f32 %v162_v37, %v143_v38  ;;  %v210_v7 = vmul.f32 %v209_v61, %v143_v38  ;;  %v243_v37 = vsub.f32 %v427_v2, %v238_v23 }
 0x14e   :  { %v141_v40 = vpop.xlane.xlu1 %140 }
 0x14f   :  { %v166_v41 = vsel %vm64_vm0, %v164_v39, 0.0  ;;  %v144_v43 = vmul.f32 0.0019569471, %v141_v40 }
 0x150   :  { %v167_v44 = vrot.slane %v166_v41, 4 }
 0x151   :  { %v165_v45 = vadd.f32 %v163_v42, %v144_v43  ;;  %v211_v14 = vmul.f32 %v209_v61, %v144_v43 }
 0x152   :  { %v168_v46 = vadd.f32 %v167_v44, %v166_v41  ;;  %v300_v28 = vpop.permute.xlu1 %299  ;;  %v274_v44 = vld [vmem:[%s537_s0 + $0x18] sm:$0xff] }
 0x153   :  { %v173_v47 = vsel %vm64_vm0, %v165_v45, 0.0  ;;  %v307_v40 = vrot.slane %v300_v28, %v457_v29 }
 0x154   :  { %v169_v48 = vrot.slane %v168_v46, 2  ;;  %v174_v49 = vrot.slane %v173_v47, 4  ;;  %v189_v50 = vadd.f32 %v173_v47, %v166_v41 }
 0x156   :  { %v170_v31 = vadd.f32 %v169_v48, %v168_v46  ;;  %v175_v52 = vadd.f32 %v174_v49, %v173_v47  ;;  %v190_v53 = vmul.f32 0.5, %v189_v50 }
 0x158   :  { %v171_v54 = vrot.slane %v170_v31, 1  ;;  %v176_v55 = vrot.slane %v175_v52, 2  ;;  %v192_v56 = vsub.f32 %v190_v53, %v191_v51 }
 0x15a   :  { %v172_v36 = vadd.f32 %v171_v54, %v170_v31  ;;  %v177_v57 = vadd.f32 %v176_v55, %v175_v52  ;;  %v220_v13 = vmul.f32 %v219_v4, %v192_v56 }
 0x15c   :  { %v180_v59 = vmul.f32 0.25, %v172_v36  ;;  %v178_v60 = vrot.slane %v177_v57, 1 }
 0x15e   :  { %v184_v63 = vsub.f32 %v180_v59, %v182_v58  ;;  %v179_v3 = vadd.f32 %v178_v60, %v177_v57 }
 0x160   :  { %v214_v8 = vmul.f32 %v213_v62, %v184_v63  ;;  %v181_v5 = vmul.f32 0.25, %v179_v3 }
 0x162   :  { %v216_v10 = vadd.f32 %v214_v8, %v210_v7  ;;  %v185_v11 = vsub.f32 %v181_v5, %v183_v9 }
 0x164   :  { %v215_v15 = vmul.f32 %v213_v62, %v185_v11  ;;  %v221_v16 = vadd.f32 %v220_v13, %v216_v10 }
 0x166   :  { %v217_v17 = vadd.f32 %v215_v15, %v211_v14  ;;  %v245_v18 = vadd.f32 1e-05, %v221_v16 }
 0x168   :  { %v222_v12 = vadd.f32 %v220_v13, %v217_v17  ;;  %337 = vrsqrt.f32 %v245_v18 }
 0x16a   :  { %v246_v19 = vadd.f32 1e-05, %v222_v12 }
 0x16c   :  { %339 = vrsqrt.f32 %v246_v19 }
 0x175   :  { %v338_v22 = vpop.eup %337 }
 0x176   :  { %v257_v26 = vrot.slane %v338_v22, %v457_v29 }
 0x178   :  { %v267_v32 = vmul.f32 %v257_v26, %v241_v24  ;;  %v268_v34 = vmul.f32 %v257_v26, %v242_v25 }
 0x179   :  { %v340_v35 = vpop.eup %339 }
 0x17a   :  { %v264_v1 = vrot.slane %v340_v35, %v457_v29  ;;  %v288_v38 = vmul.f32 %v286_v27, %v267_v32  ;;  %v289_v39 = vmul.f32 %v286_v27, %v268_v34 }
 0x17c   :  { %v269_v41 = vmul.f32 %v264_v1, %v243_v37  ;;  %v270_v42 = vmul.f32 %v264_v1, %v244_v30  ;;  %v292_v43 = vadd.f32 %v288_v38, %v271_v33  ;;  %v293_v2 = vadd.f32 %v289_v39, %v272_v0 }
 0x17e   :  { %v290_v45 = vmul.f32 %v286_v27, %v269_v41  ;;  %v291_v46 = vmul.f32 %v286_v27, %v270_v42  ;;  %v309_v47 = vadd.f32 %v307_v40, %v292_v43  ;;  %v310_v48 = vadd.f32 %v307_v40, %v293_v2 }
 0x180   :  { %v294_v49 = vadd.f32 %v290_v45, %v273_v6  ;;  %v295_v50 = vadd.f32 %v291_v46, %v274_v44  ;;  %313 = vst [vmem:[%s543_s6] sm:$0xff] %v309_v47  ;;  %314 = vst [vmem:[%s543_s6 + $0x8] sm:$0xff] %v310_v48 }
 0x182   :  { %v311_v29 = vadd.f32 %v307_v40, %v294_v49  ;;  %v312_v31 = vadd.f32 %v307_v40, %v295_v50 }
 0x184   :  { %315 = vst [vmem:[%s543_s6 + $0x10] sm:$0xff] %v311_v29  ;;  %316 = vst [vmem:[%s543_s6 + $0x18] sm:$0xff] %v312_v31 }
 0x185   :  { %321 = vsyncpa [#allocation3], 1 }
 0x186   :  { %322 = vsyncpa [#allocation5], 1 }

// kernel: upcond_forward.19
= control target key start
LH: loop header
LB: loop body
LE: loop exit
PB: predicated region body
PF: predicated region fallthrough
CT: control target
= control target key end

     0   :  { %s659_s12 = smov 0   ;;  %s661_s13 = smov 0   ;;  %s756_s0 = inlined_call_operand.vmem [shape: f32[2,104,512], index: 0, kind: input, shape index: {}]   ;;  %s757_s1 = inlined_call_operand.vmem [shape: f32[8,104], index: 1, kind: input, shape index: {}]   ;;  %s758_s2 = inlined_call_operand.vmem [shape: f32[8,1], index: 2, kind: input, shape index: {}]   ;;  %s759_s3 = inlined_call_operand.vmem [shape: f32[2,4,512], index: 3, kind: output, shape index: {}]  }
   0x1   :  { %s663_s14 = smov 0  }
   0x2 LB: > { %s25_s15 = sadd.s32 1, %s631_s13  ;;  %p556_p0 = scmp.ge.s32.totalorder %s635_s14, 1  ;;  %s635_s14 = sphi %s663_s14, %s13_s14   ;;  %s631_s13 = sphi %s661_s13, %s761_s13   ;;  %s627_s12 = sphi %s659_s12, %s760_s12  }
   0x3   : > { %p27_p1 = scmp.ge.s32.totalorder %s25_s15, 2  ;;  %p158_p2 = scmp.lt.s32.totalorder %s635_s14, 3 }
   0x5   : > { %s763_s15 = smov (%p27_p1, %s25_s15), 0  ;;  %p159_p3 = pnand %p556_p0, %p158_p2 }
   0x6   : > { %p191_p4 = scmp.lt.s32.totalorder (!%p159_p3), %s627_s12, 1 }
   0x7   : > { %162 = sbr.rel (%p159_p3) target bundleno = 280 (0x118), region = 32 }
   0xc   : > { %v263_v0 = vld [vmem:[%s758_s2] sm:$0xff]  ;;  %v637_v1 = vmov 0.0   ;;  %s765_s12 = smov (!%p191_p4, %s627_s12), 1  ;;  %v638_v2 = vmov 0   ;;  %vm269_vm0 = vcmask 850944  }
   0xd   : > { %337 = vmatprep.mubr.f32.mxu0 %v637_v1  ;;  %408 = vmatprep.mubr.f32.mxu1 %v637_v1  ;;  %s569_s18 = smul.u32 416, %s765_s12  ;;  %v210_v55 = vld [vmem:[%s757_s1] sm:$0xff]  ;;  %s568_s24 = sshll.u32 %s765_s12, 4 }
   0xe   : > { %596 = vset.pattern.permute.xlu0 %v638_v2  ;;  %s208_s27 = scalar_lea.vmem %s759_s3, %s568_s24 }
   0xf   : > { %266 = vperm.xlu0 %596, %v263_v0   ;;  %s686_s21 = scalar_lea.vmem %s756_s0, %s569_s18 }
  0x10   : > { %v260_v3 = vld [vmem:[%s686_s21 + $0x188] sm:$0xff]  ;;  %v262_v4 = vld [vmem:[%s686_s21 + $0x198] sm:$0xff]  ;;  %v259_v5 = vld [vmem:[%s686_s21 + $0x180] sm:$0xff] }
  0x11   : > { %279 = vmatprep.subr.mxu0 %v260_v3  ;;  %350 = vmatprep.subr.mxu1 %v262_v4  ;;  %v261_v6 = vld [vmem:[%s686_s21 + $0x190] sm:$0xff]  ;;  %v256_v7 = vld [vmem:[%s686_s21 + $0x168] sm:$0xff]  ;;  %v258_v8 = vld [vmem:[%s686_s21 + $0x178] sm:$0xff] }
  0x12   : > { %280 = vmatpush1.msra.mxu0 %v259_v5  ;;  %351 = vmatpush1.msra.mxu1 %v261_v6  ;;  %v255_v9 = vld [vmem:[%s686_s21 + $0x160] sm:$0xff]  ;;  %v257_v10 = vld [vmem:[%s686_s21 + $0x170] sm:$0xff]  ;;  %v252_v11 = vld [vmem:[%s686_s21 + $0x148] sm:$0xff] }
  0x13   : > { %281 = vmatprep.subr.mxu0 %v256_v7  ;;  %352 = vmatprep.subr.mxu1 %v258_v8  ;;  %v254_v12 = vld [vmem:[%s686_s21 + $0x158] sm:$0xff]  ;;  %v251_v13 = vld [vmem:[%s686_s21 + $0x140] sm:$0xff]  ;;  %v253_v14 = vld [vmem:[%s686_s21 + $0x150] sm:$0xff] }
  0x14   : > { %282 = vmatpush1.msra.mxu0 %v255_v9  ;;  %353 = vmatpush1.msra.mxu1 %v257_v10  ;;  %v248_v15 = vld [vmem:[%s686_s21 + $0x128] sm:$0xff]  ;;  %v250_v16 = vld [vmem:[%s686_s21 + $0x138] sm:$0xff]  ;;  %v247_v17 = vld [vmem:[%s686_s21 + $0x120] sm:$0xff] }
  0x15   : > { %283 = vmatprep.subr.mxu0 %v252_v11  ;;  %354 = vmatprep.subr.mxu1 %v254_v12  ;;  %v249_v18 = vld [vmem:[%s686_s21 + $0x130] sm:$0xff]  ;;  %v244_v19 = vld [vmem:[%s686_s21 + $0x108] sm:$0xff]  ;;  %v246_v20 = vld [vmem:[%s686_s21 + $0x118] sm:$0xff] }
  0x16   : > { %284 = vmatpush1.msra.mxu0 %v251_v13  ;;  %355 = vmatpush1.msra.mxu1 %v253_v14  ;;  %v243_v21 = vld [vmem:[%s686_s21 + $0x100] sm:$0xff]  ;;  %v245_v22 = vld [vmem:[%s686_s21 + $0x110] sm:$0xff]  ;;  %v240_v23 = vld [vmem:[%s686_s21 + $0xe8] sm:$0xff] }
  0x17   : > { %285 = vmatprep.subr.mxu0 %v248_v15  ;;  %356 = vmatprep.subr.mxu1 %v250_v16  ;;  %v242_v24 = vld [vmem:[%s686_s21 + $0xf8] sm:$0xff]  ;;  %v239_v25 = vld [vmem:[%s686_s21 + $0xe0] sm:$0xff]  ;;  %v241_v26 = vld [vmem:[%s686_s21 + $0xf0] sm:$0xff] }
  0x18   : > { %286 = vmatpush1.msra.mxu0 %v247_v17  ;;  %357 = vmatpush1.msra.mxu1 %v249_v18  ;;  %v236_v27 = vld [vmem:[%s686_s21 + $0xc8] sm:$0xff]  ;;  %v238_v28 = vld [vmem:[%s686_s21 + $0xd8] sm:$0xff]  ;;  %v235_v29 = vld [vmem:[%s686_s21 + $0xc0] sm:$0xff] }
  0x19   : > { %287 = vmatprep.subr.mxu0 %v244_v19  ;;  %358 = vmatprep.subr.mxu1 %v246_v20  ;;  %v237_v30 = vld [vmem:[%s686_s21 + $0xd0] sm:$0xff]  ;;  %v232_v31 = vld [vmem:[%s686_s21 + $0xa8] sm:$0xff]  ;;  %v234_v32 = vld [vmem:[%s686_s21 + $0xb8] sm:$0xff] }
  0x1a   : > { %288 = vmatpush1.msra.mxu0 %v243_v21  ;;  %359 = vmatpush1.msra.mxu1 %v245_v22  ;;  %v231_v33 = vld [vmem:[%s686_s21 + $0xa0] sm:$0xff]  ;;  %v233_v34 = vld [vmem:[%s686_s21 + $0xb0] sm:$0xff]  ;;  %v228_v35 = vld [vmem:[%s686_s21 + $0x88] sm:$0xff] }
  0x1b   : > { %289 = vmatprep.subr.mxu0 %v240_v23  ;;  %360 = vmatprep.subr.mxu1 %v242_v24  ;;  %v230_v36 = vld [vmem:[%s686_s21 + $0x98] sm:$0xff]  ;;  %v227_v37 = vld [vmem:[%s686_s21 + $0x80] sm:$0xff]  ;;  %v229_v38 = vld [vmem:[%s686_s21 + $0x90] sm:$0xff] }
  0x1c   : > { %290 = vmatpush1.msra.mxu0 %v239_v25  ;;  %361 = vmatpush1.msra.mxu1 %v241_v26  ;;  %v224_v39 = vld [vmem:[%s686_s21 + $0x68] sm:$0xff]  ;;  %v226_v40 = vld [vmem:[%s686_s21 + $0x78] sm:$0xff]  ;;  %v223_v41 = vld [vmem:[%s686_s21 + $0x60] sm:$0xff] }
  0x1d   : > { %291 = vmatprep.subr.mxu0 %v236_v27  ;;  %362 = vmatprep.subr.mxu1 %v238_v28  ;;  %v225_v42 = vld [vmem:[%s686_s21 + $0x70] sm:$0xff]  ;;  %v220_v43 = vld [vmem:[%s686_s21 + $0x48] sm:$0xff]  ;;  %v222_v44 = vld [vmem:[%s686_s21 + $0x58] sm:$0xff] }
  0x1e   : > { %292 = vmatpush1.msra.mxu0 %v235_v29  ;;  %363 = vmatpush1.msra.mxu1 %v237_v30  ;;  %v219_v45 = vld [vmem:[%s686_s21 + $0x40] sm:$0xff]  ;;  %v221_v46 = vld [vmem:[%s686_s21 + $0x50] sm:$0xff]  ;;  %v216_v47 = vld [vmem:[%s686_s21 + $0x28] sm:$0xff] }
  0x1f   : > { %293 = vmatprep.subr.mxu0 %v232_v31  ;;  %364 = vmatprep.subr.mxu1 %v234_v32  ;;  %v218_v48 = vld [vmem:[%s686_s21 + $0x38] sm:$0xff]  ;;  %v215_v49 = vld [vmem:[%s686_s21 + $0x20] sm:$0xff]  ;;  %v217_v50 = vld [vmem:[%s686_s21 + $0x30] sm:$0xff] }
  0x20   : > { %294 = vmatpush1.msra.mxu0 %v231_v33  ;;  %365 = vmatpush1.msra.mxu1 %v233_v34  ;;  %v212_v51 = vld [vmem:[%s686_s21 + $0x8] sm:$0xff]  ;;  %v214_v52 = vld [vmem:[%s686_s21 + $0x18] sm:$0xff]  ;;  %v211_v53 = vld [vmem:[%s686_s21] sm:$0xff] }
  0x21   : > { %295 = vmatprep.subr.mxu0 %v228_v35  ;;  %366 = vmatprep.subr.mxu1 %v230_v36  ;;  %v213_v54 = vld [vmem:[%s686_s21 + $0x10] sm:$0xff] }
  0x22   : > { %296 = vmatpush1.msra.mxu0 %v227_v37  ;;  %367 = vmatpush1.msra.mxu1 %v229_v38 }
  0x23   : > { %297 = vmatprep.subr.mxu0 %v224_v39  ;;  %368 = vmatprep.subr.mxu1 %v226_v40 }
  0x24   : > { %298 = vmatpush1.msra.mxu0 %v223_v41  ;;  %369 = vmatpush1.msra.mxu1 %v225_v42 }
  0x25   : > { %299 = vmatprep.subr.mxu0 %v220_v43  ;;  %370 = vmatprep.subr.mxu1 %v222_v44 }
  0x26   : > { %300 = vmatpush1.msra.mxu0 %v219_v45  ;;  %371 = vmatpush1.msra.mxu1 %v221_v46 }
  0x27   : > { %301 = vmatprep.subr.mxu0 %v216_v47  ;;  %372 = vmatprep.subr.mxu1 %v218_v48 }
  0x28   : > { %302 = vmatpush1.msra.mxu0 %v215_v49  ;;  %373 = vmatpush1.msra.mxu1 %v217_v50 }
  0x29   : > { %303 = vmatprep.subr.mxu0 %v212_v51  ;;  %374 = vmatprep.subr.mxu1 %v214_v52 }
  0x2a   : > { %304 = vmatpush1.msra.mxu0 %v211_v53  ;;  %375 = vmatpush1.msra.mxu1 %v213_v54 }
  0x2b   : > { %560 = vmatmul.mubr.msk.f32.vlgmr.msra.gmra.mxu0 %vm269_vm0, %v210_v55  ;;  %561 = vmatmul.mubr.msk.f32.vlgmr.msra.gmra.mxu1 %vm269_vm0, %v210_v55 }
  0x8a   : > { %v267_v56 = vpop.permute.xlu0 %266 }
  0xeb   : > { %v339_v57 = vpop.f32.mrf.mxu0  ;;  %v410_v58 = vpop.f32.mrf.mxu1 }
  0xec   : > { %v340_v59 = vadd.f32 %v339_v57, %v267_v56  ;;  %v411_v60 = vadd.f32 %v410_v58, %v267_v56 }
  0xed   : > { %v341_v61 = vpop.f32.mrf.mxu0  ;;  %v412_v62 = vpop.f32.mrf.mxu1 }
  0xee   : > { %v562_v63 = vmul.f32 -1.442695, %v340_v59  ;;  %v564_v0 = vmul.f32 -1.442695, %v411_v60  ;;  %v342_v1 = vadd.f32 %v341_v61, %v267_v56  ;;  %v413_v2 = vadd.f32 %v412_v62, %v267_v56 }
  0xf0   : > { %597 = vpow2.f32 %v562_v63  ;;  %v563_v3 = vmul.f32 -1.442695, %v342_v1  ;;  %v565_v4 = vmul.f32 -1.442695, %v413_v2 }
  0xf1   : > { %599 = vpow2.f32 %v564_v0 }
  0xf2   : > { %601 = vpow2.f32 %v563_v3 }
  0xf3   : > { %603 = vpow2.f32 %v565_v4 }
  0xfd   : > { %v598_v5 = vpop.eup %597 }
  0xfe   : > { %v600_v6 = vpop.eup %599  ;;  %v427_v7 = vadd.f32 1.0, %v598_v5 }
  0xff   : > { %v602_v8 = vpop.eup %601  ;;  %v429_v9 = vadd.f32 1.0, %v600_v6 }
 0x100   : > { %v604_v10 = vpop.eup %603  ;;  %605 = vrcp.f32 %v427_v7  ;;  %v428_v11 = vadd.f32 1.0, %v602_v8 }
 0x101   : > { %607 = vrcp.f32 %v429_v9  ;;  %v430_v12 = vadd.f32 1.0, %v604_v10 }
 0x102   : > { %609 = vrcp.f32 %v428_v11 }
 0x103   : > { %611 = vrcp.f32 %v430_v12 }
 0x10d   : > { %v606_v13 = vpop.eup %605 }
 0x10e   : > { %v608_v14 = vpop.eup %607  ;;  %v443_v15 = vrot.slane %v606_v13, 4 }
 0x10f   : > { %v610_v16 = vpop.eup %609  ;;  %v445_v17 = vrot.slane %v608_v14, 4 }
 0x110   : > { %v612_v18 = vpop.eup %611  ;;  %v444_v19 = vrot.slane %v610_v16, 4  ;;  %v451_v21 = vmul.f32 %v443_v15, %v340_v59 }
 0x111   : > { %v446_v20 = vrot.slane %v612_v18, 4  ;;  %v453_v23 = vmul.f32 %v445_v17, %v411_v60 }
 0x112   : > { %v452_v22 = vmul.f32 %v444_v19, %v342_v1 }
 0x113   : > { %v454_v24 = vmul.f32 %v446_v20, %v413_v2 }
 0x114   : > { %v459_v25 = vcombine.low %v451_v21, %v452_v22 }
 0x115   : > { %v460_v26 = vcombine.low %v453_v23, %v454_v24 }
 0x116   : > { %463 = vst [vmem:[%s208_s27] sm:$0xff] %v459_v25 }
 0x117   : > { %464 = vst [vmem:[%s208_s27 + $0x8] sm:$0xff] %v460_v26 }
 0x118 PF: > { %s13_s14 = sadd.s32 1, %s635_s14   ;;  %s760_s12 = smov %s631_s13 }
 0x119   : > { %p10_p5 = scmp.ge.s32.totalorder %s13_s14, 4   ;;  %s761_s13 = smov %s763_s15 }
 0x11b   :  { %12 = sbr.rel (!%p10_p5) target bundleno = 2 (0x2), region = 62 }

// kernel: upcond_forward.29
= control target key start
LH: loop header
LB: loop body
LE: loop exit
PB: predicated region body
PF: predicated region fallthrough
CT: control target
= control target key end

     0   :  { %s612_s12 = smov 0   ;;  %s614_s13 = smov 0   ;;  %s655_s0 = inlined_call_operand.vmem [shape: f32[2,8,512], index: 0, kind: input, shape index: {}]   ;;  %s656_s1 = inlined_call_operand.vmem [shape: f32[8,8], index: 1, kind: input, shape index: {}]   ;;  %s657_s2 = inlined_call_operand.vmem [shape: f32[8,1], index: 2, kind: input, shape index: {}]   ;;  %s658_s3 = inlined_call_operand.vmem [shape: f32[2,4,512], index: 3, kind: output, shape index: {}]  }
   0x1   :  { %s616_s14 = smov 0  }
   0x2 LB: > { %s25_s15 = sadd.s32 1, %s584_s13  ;;  %p508_p0 = scmp.ge.s32.totalorder %s588_s14, 1  ;;  %s588_s14 = sphi %s616_s14, %s13_s14   ;;  %s584_s13 = sphi %s614_s13, %s660_s13   ;;  %s580_s12 = sphi %s612_s12, %s659_s12  }
   0x3   : > { %p27_p1 = scmp.ge.s32.totalorder %s25_s15, 2  ;;  %p158_p2 = scmp.lt.s32.totalorder %s588_s14, 3 }
   0x5   : > { %s662_s15 = smov (%p27_p1, %s25_s15), 0  ;;  %p159_p3 = pnand %p508_p0, %p158_p2 }
   0x6   : > { %p191_p4 = scmp.lt.s32.totalorder (!%p159_p3), %s580_s12, 1 }
   0x7   : > { %162 = sbr.rel (%p159_p3) target bundleno = 255 (0xff), region = 32 }
   0xc   : > { %v215_v0 = vld [vmem:[%s657_s2] sm:$0xff]  ;;  %v590_v1 = vmov 0.0   ;;  %s664_s12 = smov (!%p191_p4, %s580_s12), 1  ;;  %v591_v2 = vmov 0   ;;  %vm221_vm0 = vcmask 64512  }
   0xd   : > { %289 = vmatprep.mubr.f32.mxu0 %v590_v1  ;;  %360 = vmatprep.mubr.f32.mxu1 %v590_v1  ;;  %s521_s18 = sshll.u32 %s664_s12, 5  ;;  %v210_v3 = vld [vmem:[%s656_s1] sm:$0xff]  ;;  %s522_s24 = sshll.u32 %s664_s12, 4 }
   0xe   : > { %549 = vset.pattern.permute.xlu0 %v591_v2  ;;  %s198_s21 = scalar_lea.vmem %s655_s0, %s521_s18  ;;  %s208_s27 = scalar_lea.vmem %s658_s3, %s522_s24 }
   0xf   : > { %218 = vperm.xlu0 %549, %v215_v0   ;;  %v212_v4 = vld [vmem:[%s198_s21 + $0x8] sm:$0xff]  ;;  %v214_v5 = vld [vmem:[%s198_s21 + $0x18] sm:$0xff]  ;;  %v211_v6 = vld [vmem:[%s198_s21] sm:$0xff] }
  0x10   : > { %255 = vmatprep.subr.mxu0 %v212_v4  ;;  %326 = vmatprep.subr.mxu1 %v214_v5  ;;  %v213_v7 = vld [vmem:[%s198_s21 + $0x10] sm:$0xff] }
  0x11   : > { %256 = vmatpush1.msra.mxu0 %v211_v6  ;;  %327 = vmatpush1.msra.mxu1 %v213_v7 }
  0x12   : > { %513 = vmatmul.mubr.msk.f32.vlgmr.msra.gmra.mxu0 %vm221_vm0, %v210_v3  ;;  %514 = vmatmul.mubr.msk.f32.vlgmr.msra.gmra.mxu1 %vm221_vm0, %v210_v3 }
  0x8a   : > { %v219_v8 = vpop.permute.xlu0 %218 }
  0xd2   : > { %v291_v9 = vpop.f32.mrf.mxu0  ;;  %v362_v10 = vpop.f32.mrf.mxu1 }
  0xd3   : > { %v292_v11 = vadd.f32 %v291_v9, %v219_v8  ;;  %v363_v12 = vadd.f32 %v362_v10, %v219_v8 }
  0xd4   : > { %v293_v13 = vpop.f32.mrf.mxu0  ;;  %v364_v14 = vpop.f32.mrf.mxu1 }
  0xd5   : > { %v515_v15 = vmul.f32 -1.442695, %v292_v11  ;;  %v517_v16 = vmul.f32 -1.442695, %v363_v12  ;;  %v294_v17 = vadd.f32 %v293_v13, %v219_v8  ;;  %v365_v18 = vadd.f32 %v364_v14, %v219_v8 }
  0xd7   : > { %550 = vpow2.f32 %v515_v15  ;;  %v516_v19 = vmul.f32 -1.442695, %v294_v17  ;;  %v518_v20 = vmul.f32 -1.442695, %v365_v18 }
  0xd8   : > { %552 = vpow2.f32 %v517_v16 }
  0xd9   : > { %554 = vpow2.f32 %v516_v19 }
  0xda   : > { %556 = vpow2.f32 %v518_v20 }
  0xe4   : > { %v551_v21 = vpop.eup %550 }
  0xe5   : > { %v553_v22 = vpop.eup %552  ;;  %v379_v23 = vadd.f32 1.0, %v551_v21 }
  0xe6   : > { %v555_v24 = vpop.eup %554  ;;  %v381_v25 = vadd.f32 1.0, %v553_v22 }
  0xe7   : > { %v557_v26 = vpop.eup %556  ;;  %558 = vrcp.f32 %v379_v23  ;;  %v380_v27 = vadd.f32 1.0, %v555_v24 }
  0xe8   : > { %560 = vrcp.f32 %v381_v25  ;;  %v382_v28 = vadd.f32 1.0, %v557_v26 }
  0xe9   : > { %562 = vrcp.f32 %v380_v27 }
  0xea   : > { %564 = vrcp.f32 %v382_v28 }
  0xf4   : > { %v559_v29 = vpop.eup %558 }
  0xf5   : > { %v561_v30 = vpop.eup %560  ;;  %v395_v31 = vrot.slane %v559_v29, 4 }
  0xf6   : > { %v563_v32 = vpop.eup %562  ;;  %v397_v33 = vrot.slane %v561_v30, 4 }
  0xf7   : > { %v565_v34 = vpop.eup %564  ;;  %v396_v35 = vrot.slane %v563_v32, 4  ;;  %v403_v37 = vmul.f32 %v395_v31, %v292_v11 }
  0xf8   : > { %v398_v36 = vrot.slane %v565_v34, 4  ;;  %v405_v39 = vmul.f32 %v397_v33, %v363_v12 }
  0xf9   : > { %v404_v38 = vmul.f32 %v396_v35, %v294_v17 }
  0xfa   : > { %v406_v40 = vmul.f32 %v398_v36, %v365_v18 }
  0xfb   : > { %v411_v41 = vcombine.low %v403_v37, %v404_v38 }
  0xfc   : > { %v412_v42 = vcombine.low %v405_v39, %v406_v40 }
  0xfd   : > { %415 = vst [vmem:[%s208_s27] sm:$0xff] %v411_v41 }
  0xfe   : > { %416 = vst [vmem:[%s208_s27 + $0x8] sm:$0xff] %v412_v42 }
  0xff PF: > { %s13_s14 = sadd.s32 1, %s588_s14   ;;  %s659_s12 = smov %s584_s13 }
 0x100   : > { %p10_p5 = scmp.ge.s32.totalorder %s13_s14, 4   ;;  %s660_s13 = smov %s662_s15 }
 0x102   :  { %12 = sbr.rel (!%p10_p5) target bundleno = 2 (0x2), region = 62 }

</bundles_post_ra>
